<compile_context>
chip_gen: v5e
topology: v5e:2x2
jax: 0.10.0
libtpu: 0.0.40
codegen_flags: <defaults>
</compile_context>

<pallas_src>
import functools

import jax
import jax.numpy as jnp
from jax.experimental import pallas as pl
from jax.experimental.pallas import tpu as pltpu

_OUT_LANES = 128   # lane-dense output slab width (prob: lanes 0-1, dist: lanes 2-4)


def _edge_gat(fs, fe, rs, el, er, ee, bias, adj, *, n):
    """EdgeGATConv message passing; all heads live (replicated) in the lane axis.

    fs : (N, W)    fc(node feats) per source node, head-major lanes
    fe : (N*N, W)  fc_edge(edge feats), row e = dst*N + src
    rs : (N, W)    res_fc(node feats)
    el : (N, W)    <attn_l, fc(node)> per source, replicated across each head's lanes
    er : (N, W)    <attn_r, fc(node)> per destination
    ee : (N*N, W)  <attn_e, fc_edge(edge)> per edge
    adj: (N, N)    adj[dst, src]
    """
    w = fs.shape[-1]
    fe3 = fe.reshape(n, n, w)
    ee3 = ee.reshape(n, n, w)

    # logits[d, s, :] = LeakyReLU_0.2( el[s] + er[d] + ee[d*N+s] )
    logits = ee3 + el[None, :, :] + er[:, None, :]
    logits = jnp.where(logits >= 0.0, logits, 0.2 * logits)

    # edge softmax over incoming edges (axis=1 == src), masked by adjacency
    adj3 = adj[:, :, None]
    masked = jnp.where(adj3 > 0.0, logits, -1e30)
    p = jnp.exp(masked - jnp.max(masked, axis=1, keepdims=True)) * adj3
    denom = jnp.maximum(jnp.sum(p, axis=1, keepdims=True), 1e-20)  # deg==0 guard
    alpha = p * pl.reciprocal(denom, approx=True)                  # (N, N, W)

    # message = alpha * (feat_src + feat_edge); aggregate = sum over incoming edges
    # TODO(synk): for large N, tile over dst-row blocks (grid axis) and turn the fs
    # term into a per-head MXU contraction instead of (N, N, W) temporaries; set
    # vmem_limit_bytes explicitly then (v7x has only 64 MiB VMEM).
    agg = jnp.sum(alpha * (fs[None, :, :] + fe3), axis=1)          # (N, W)
    return agg + rs + bias


def _model_kernel(x_ref, ef_ref, adj_ref, wx_ref, wedge_ref, wh_ref, wsage_ref,
                  bias_ref, out_ref, *, n, hd, hid):
    f32 = jnp.float32
    x = x_ref[...]          # (N, F_node)
    ef = ef_ref[...]        # (N*N, F_edge)
    adj = adj_ref[...]      # (N, N)

    def dot(a, b):
        return jnp.dot(a, b, preferred_element_type=f32)

    # ---- fused projections: attention dot-products folded into the slabs ----
    xw = dot(x, wx_ref[...])        # (N, 4*hd)           = [fc1 | res1 | el1 | er1]
    ew = dot(ef, wedge_ref[...])    # (N*N, 2*hd + 2*hid) = [fe1 | ee1 | fe2 | ee2]

    # ---- conv1: EdgeGATConv(F_node, F_edge, hid, 8 heads) + ReLU ----
    h1 = _edge_gat(xw[:, :hd], ew[:, :hd], xw[:, hd:2 * hd],
                   xw[:, 2 * hd:3 * hd], xw[:, 3 * hd:4 * hd], ew[:, hd:2 * hd],
                   bias_ref[0:1, :hd], adj, n=n)
    h1 = jnp.maximum(h1, 0.0)       # (N, hd) head-major == torch reshape(N, -1)

    # ---- conv2: EdgeGATConv(hd, F_edge, hid, 1 head) + ReLU ----
    hw = dot(h1, wh_ref[...])       # (N, 4*hid)          = [fc2 | res2 | el2 | er2]
    h2 = _edge_gat(hw[:, :hid], ew[:, 2 * hd:2 * hd + hid], hw[:, hid:2 * hid],
                   hw[:, 2 * hid:3 * hid], hw[:, 3 * hid:4 * hid],
                   ew[:, 2 * hd + hid:2 * hd + 2 * hid],
                   bias_ref[1:2, :hid], adj, n=n)
    h2 = jnp.maximum(h2, 0.0)       # (N, hid)

    # ---- conv3 / conv4: SAGEConv('mean'); logits lane-padded to 128 by the slab ----
    deg = jnp.sum(adj, axis=1, keepdims=True)
    neigh = dot(adj, h2) * pl.reciprocal(jnp.maximum(deg, 1.0), approx=True)
    wsage = wsage_ref[...]          # (hid, 256) = [self3|self4|0.. | neigh3|neigh4|0..]
    z = (dot(h2, wsage[:, :_OUT_LANES]) + dot(neigh, wsage[:, _OUT_LANES:])
         + bias_ref[2:3, :_OUT_LANES])                              # (N, 128)

    # fused class softmaxes (lanes 0-1 -> prob, 2-4 -> dist, rest stays 0),
    # exact normalization, single unmasked full-lane store
    lane = jax.lax.broadcasted_iota(jnp.int32, z.shape, 1)
    is_p = lane < 2
    is_d = jnp.logical_and(lane >= 2, lane < 5)
    neg = jnp.float32(-1e30)
    mp = jnp.max(jnp.where(is_p, z, neg), axis=1, keepdims=True)
    md = jnp.max(jnp.where(is_d, z, neg), axis=1, keepdims=True)
    shifted = jnp.where(jnp.logical_or(is_p, is_d), z - jnp.where(is_p, mp, md), neg)
    e = jnp.exp(shifted)                                            # 0 on padding lanes
    sp = jnp.sum(jnp.where(is_p, e, 0.0), axis=1, keepdims=True)
    sd = jnp.sum(e, axis=1, keepdims=True) - sp
    out_ref[...] = e / jnp.where(is_p, sp, sd)


def _attn_fold(w, a):
    """Fold a per-head attention vector into a projection matrix (host-side).

    w: (in, H*D) head-major projection; a: (H, D) per-head attention vector.
    Returns m (in, H*D) such that (x @ m)[:, h*D + k] = <(x @ w)[:, h*D:(h+1)*D], a[h]>,
    i.e. the attention logit term already replicated across each head's D lanes.
    """
    h, d = a.shape
    scal = jnp.einsum('nhd,hd->nh', w.reshape(w.shape[0], h, d), a)
    return jnp.repeat(scal, d, axis=1)


def _pad_cols(w, width):
    return jnp.pad(w, ((0, 0), (0, width - w.shape[1])))


def model_forward(node_x, edge_flat, adj, params):
    (wfc1, wed1, wres1, al1, ar1, ae1, b1,
     wfc2, wed2, wres2, al2, ar2, ae2, b2,
     ws3, wn3, b3, ws4, wn4, b4) = params

    single = node_x.ndim == 2
    if single:
        node_x, edge_flat, adj = node_x[None], edge_flat[None], adj[None]
    bsz, n, _ = node_x.shape
    heads, hid = al1.shape
    hd = heads * hid

    # ---- host-side packing: 20 small tensors -> 5 slabs, attention terms folded ----
    w_x1 = jnp.concatenate(
        [wfc1, wres1, _attn_fold(wfc1, al1), _attn_fold(wfc1, ar1)], axis=1)   # (F_node, 4*hd)
    w_edge = jnp.concatenate(
        [wed1, _attn_fold(wed1, ae1), wed2, _attn_fold(wed2, ae2)], axis=1)    # (F_edge, 2*hd+2*hid)
    w_h1 = jnp.concatenate(
        [wfc2, wres2, _attn_fold(wfc2, al2), _attn_fold(wfc2, ar2)], axis=1)   # (hd, 4*hid)
    w_sage = jnp.concatenate(
        [_pad_cols(jnp.concatenate([ws3, ws4], axis=1), _OUT_LANES),
         _pad_cols(jnp.concatenate([wn3, wn4], axis=1), _OUT_LANES)], axis=1)  # (hid, 256)
    lanes = max(hd, _OUT_LANES)
    bias = jnp.zeros((3, lanes), jnp.float32)
    bias = bias.at[0, :hd].set(b1[0])
    bias = bias.at[1, :hid].set(b2[0])
    bias = bias.at[2, :2].set(b3[0])
    bias = bias.at[2, 2:5].set(b4[0])

    # TODO(synk): cast edge_flat / w_edge to bfloat16 for the MXU once N or the batch
    # grows (halves the dominant HBM + MXU cost on v6e/v7x); keep softmax math in f32.

    def graph_spec(*tail):
        return pl.BlockSpec((None,) + tail, lambda b: (b, 0, 0))

    def weight_spec(w):
        return pl.BlockSpec(w.shape, lambda b: (0, 0))   # constant -> stays VMEM-resident

    out = pl.pallas_call(
        functools.partial(_model_kernel, n=n, hd=hd, hid=hid),
        out_shape=jax.ShapeDtypeStruct((bsz, n, _OUT_LANES), jnp.float32),
        grid=(bsz,),
        in_specs=[
            graph_spec(n, node_x.shape[-1]),
            graph_spec(n * n, edge_flat.shape[-1]),
            graph_spec(n, n),
            weight_spec(w_x1), weight_spec(w_edge), weight_spec(w_h1),
            weight_spec(w_sage), weight_spec(bias),
        ],
        out_specs=graph_spec(n, _OUT_LANES),
        compiler_params=pltpu.CompilerParams(dimension_semantics=("parallel",)),
    )(node_x, edge_flat, adj, w_x1, w_edge, w_h1, w_sage, bias)

    prob, dist = out[:, :, :2], out[:, :, 2:5]
    if single:
        prob, dist = prob[0], dist[0]
    return prob, dist


if __name__ == "__main__":
    B, N, F_NODE, F_EDGE, HID, HEADS = 4, 8, 16, 8, 16, 8

    key = jax.random.PRNGKey(0)
    ks = iter(jax.random.split(key, 64))

    def nrm(shape, scale=0.2):
        return scale * jax.random.normal(next(ks), shape, dtype=jnp.float32)

    # deterministic graphs: in graph b, node d receives edges from sources
    # (d + o) % N for offsets o in offset_sets[b]  (in-degree 3 everywhere)
    d_idx = jnp.arange(N)[:, None]
    s_idx = jnp.arange(N)[None, :]
    diff = (s_idx - d_idx) % N
    offset_sets = [(1, 3, 5), (1, 2, 4), (2, 3, 6), (1, 4, 7)]
    adj = jnp.stack([
        jnp.logical_or(jnp.logical_or(diff == o0, diff == o1), diff == o2)
        .astype(jnp.float32)
        for (o0, o1, o2) in offset_sets])                         # (B, N, N)

    node_x = nrm((B, N, F_NODE), 1.0)
    edge_flat = nrm((B, N * N, F_EDGE), 1.0) * adj.reshape(B, N * N, 1)

    params = (
        # conv1: EdgeGATConv(F_NODE, F_EDGE, HID, 8)  (DGL defaults: residual, bias)
        nrm((F_NODE, HEADS * HID)),   # fc        (in, heads*out), pre-transposed
        nrm((F_EDGE, HEADS * HID)),   # fc_edge
        nrm((F_NODE, HEADS * HID)),   # res_fc
        nrm((HEADS, HID)),            # attn_l
        nrm((HEADS, HID)),            # attn_r
        nrm((HEADS, HID)),            # attn_edge
        nrm((1, HEADS * HID)),        # bias
        # conv2: EdgeGATConv(HEADS*HID, F_EDGE, HID, 1)
        nrm((HEADS * HID, HID)),      # fc
        nrm((F_EDGE, HID)),           # fc_edge
        nrm((HEADS * HID, HID)),      # res_fc
        nrm((1, HID)),                # attn_l
        nrm((1, HID)),                # attn_r
        nrm((1, HID)),                # attn_edge
        nrm((1, HID)),                # bias
        # conv3: SAGEConv(HID, 2, 'mean')
        nrm((HID, 2)),                # fc_self
        nrm((HID, 2)),                # fc_neigh
        nrm((1, 2)),                  # bias
        # conv4: SAGEConv(HID, 3, 'mean')
        nrm((HID, 3)),                # fc_self
        nrm((HID, 3)),                # fc_neigh
        nrm((1, 3)),                  # bias
    )

    prob, dist = jax.jit(model_forward)(node_x, edge_flat, adj, params)
    jax.block_until_ready((prob, dist))
    assert prob.shape == (B, N, 2) and dist.shape == (B, N, 3)
    assert bool(jnp.all(jnp.isfinite(prob))) and bool(jnp.all(jnp.isfinite(dist)))
    assert bool(jnp.all(jnp.abs(jnp.sum(prob, axis=-1) - 1.0) < 1e-3))
    assert bool(jnp.all(jnp.abs(jnp.sum(dist, axis=-1) - 1.0) < 1e-3))

    # single-graph path must agree with the batched one
    prob0, dist0 = jax.jit(model_forward)(node_x[0], edge_flat[0], adj[0], params)
    jax.block_until_ready((prob0, dist0))
    assert prob0.shape == (N, 2) and dist0.shape == (N, 3)
    assert bool(jnp.all(jnp.abs(prob0 - prob[0]) < 1e-5))
    assert bool(jnp.all(jnp.abs(dist0 - dist[0]) < 1e-5))
    print("KERNEL_OK")
</pallas_src>

<mosaic_0001>
module attributes {stable_mosaic.version = 11 : i64} {
  func.func @_model_kernel(%arg0: i32, %arg1: memref<1x8x16xf32, #tpu.memory_space<vmem>>, %arg2: memref<1x64x8xf32, #tpu.memory_space<vmem>>, %arg3: memref<1x8x8xf32, #tpu.memory_space<vmem>>, %arg4: memref<16x512xf32, #tpu.memory_space<vmem>>, %arg5: memref<8x288xf32, #tpu.memory_space<vmem>>, %arg6: memref<128x64xf32, #tpu.memory_space<vmem>>, %arg7: memref<16x256xf32, #tpu.memory_space<vmem>>, %arg8: memref<3x128xf32, #tpu.memory_space<vmem>>, %arg9: memref<1x8x128xf32, #tpu.memory_space<vmem>>) attributes {dimension_semantics = [#tpu.dimension_semantics<parallel>], iteration_bounds = array<i64: 4>, scalar_prefetch = 0 : i64, scratch_operands = 0 : i64, tpu.core_type = #tpu.core_type<tc>, window_params = [{transform_indices = @transform_0, window_bounds = array<i64: 1, 8, 16>}, {transform_indices = @transform_1, window_bounds = array<i64: 1, 64, 8>}, {transform_indices = @transform_2, window_bounds = array<i64: 1, 8, 8>}, {pipeline_mode = #tpu.pipeline_mode<synchronous>, transform_indices = @transform_3, window_bounds = array<i64: 16, 512>}, {pipeline_mode = #tpu.pipeline_mode<synchronous>, transform_indices = @transform_4, window_bounds = array<i64: 8, 288>}, {pipeline_mode = #tpu.pipeline_mode<synchronous>, transform_indices = @transform_5, window_bounds = array<i64: 128, 64>}, {pipeline_mode = #tpu.pipeline_mode<synchronous>, transform_indices = @transform_6, window_bounds = array<i64: 16, 256>}, {pipeline_mode = #tpu.pipeline_mode<synchronous>, transform_indices = @transform_7, window_bounds = array<i64: 3, 128>}, {transform_indices = @transform_8, window_bounds = array<i64: 1, 8, 128>}]} {
    %c0 = arith.constant 0 : index
    %c0_0 = arith.constant 0 : index
    %c0_1 = arith.constant 0 : index
    %0 = vector.load %arg1[%c0, %c0_0, %c0_1] : memref<1x8x16xf32, #tpu.memory_space<vmem>>, vector<1x8x16xf32>
    %1 = vector.shape_cast %0 : vector<1x8x16xf32> to vector<8x16xf32>
    %c0_2 = arith.constant 0 : index
    %c0_3 = arith.constant 0 : index
    %c0_4 = arith.constant 0 : index
    %2 = vector.load %arg2[%c0_2, %c0_3, %c0_4] : memref<1x64x8xf32, #tpu.memory_space<vmem>>, vector<1x64x8xf32>
    %3 = vector.shape_cast %2 : vector<1x64x8xf32> to vector<64x8xf32>
    %c0_5 = arith.constant 0 : index
    %c0_6 = arith.constant 0 : index
    %c0_7 = arith.constant 0 : index
    %4 = vector.load %arg3[%c0_5, %c0_6, %c0_7] : memref<1x8x8xf32, #tpu.memory_space<vmem>>, vector<1x8x8xf32>
    %5 = vector.shape_cast %4 : vector<1x8x8xf32> to vector<8x8xf32>
    %c0_8 = arith.constant 0 : index
    %c0_9 = arith.constant 0 : index
    %6 = vector.load %arg4[%c0_8, %c0_9] : memref<16x512xf32, #tpu.memory_space<vmem>>, vector<16x512xf32>
    %cst = arith.constant dense<0.000000e+00> : vector<8x512xf32>
    %7 = tpu.matmul %1, %6, %cst {dimension_numbers = #tpu.dot_dimension_numbers<[1], [0], [0], [1], [0, 0, 1, 1], [], []>} : vector<8x16xf32>, vector<16x512xf32>, vector<8x512xf32> -> vector<8x512xf32>
    %c0_10 = arith.constant 0 : index
    %c0_11 = arith.constant 0 : index
    %8 = vector.load %arg5[%c0_10, %c0_11] : memref<8x288xf32, #tpu.memory_space<vmem>>, vector<8x288xf32>
    %cst_12 = arith.constant dense<0.000000e+00> : vector<64x288xf32>
    %9 = tpu.matmul %3, %8, %cst_12 {dimension_numbers = #tpu.dot_dimension_numbers<[1], [0], [0], [1], [0, 0, 1, 1], [], []>} : vector<64x8xf32>, vector<8x288xf32>, vector<64x288xf32> -> vector<64x288xf32>
    %10 = vector.extract_strided_slice %7 {offsets = [0, 0], sizes = [8, 128], strides = [1, 1]} : vector<8x512xf32> to vector<8x128xf32>
    %11 = vector.extract_strided_slice %9 {offsets = [0, 0], sizes = [64, 128], strides = [1, 1]} : vector<64x288xf32> to vector<64x128xf32>
    %12 = vector.extract_strided_slice %7 {offsets = [0, 128], sizes = [8, 128], strides = [1, 1]} : vector<8x512xf32> to vector<8x128xf32>
    %13 = vector.extract_strided_slice %7 {offsets = [0, 256], sizes = [8, 128], strides = [1, 1]} : vector<8x512xf32> to vector<8x128xf32>
    %14 = vector.extract_strided_slice %7 {offsets = [0, 384], sizes = [8, 128], strides = [1, 1]} : vector<8x512xf32> to vector<8x128xf32>
    %15 = vector.extract_strided_slice %9 {offsets = [0, 128], sizes = [64, 128], strides = [1, 1]} : vector<64x288xf32> to vector<64x128xf32>
    %c0_13 = arith.constant 0 : index
    %c0_14 = arith.constant 0 : index
    %16 = vector.load %arg8[%c0_13, %c0_14] : memref<3x128xf32, #tpu.memory_space<vmem>>, vector<1x128xf32>
    %17 = vector.shape_cast %11 : vector<64x128xf32> to vector<8x8x128xf32>
    %18 = vector.shape_cast %15 : vector<64x128xf32> to vector<8x8x128xf32>
    %19 = vector.shape_cast %13 : vector<8x128xf32> to vector<1x8x128xf32>
    %20 = vector.broadcast %19 : vector<1x8x128xf32> to vector<8x8x128xf32>
    %21 = arith.addf %18, %20 : vector<8x8x128xf32>
    %22 = vector.shape_cast %14 : vector<8x128xf32> to vector<8x1x128xf32>
    %23 = vector.broadcast %22 : vector<8x1x128xf32> to vector<8x8x128xf32>
    %24 = arith.addf %21, %23 : vector<8x8x128xf32>
    %cst_15 = arith.constant 0.000000e+00 : f32
    %25 = vector.broadcast %cst_15 : f32 to vector<8x8x128xf32>
    %26 = arith.cmpf oge, %24, %25 : vector<8x8x128xf32>
    %cst_16 = arith.constant 2.000000e-01 : f32
    %27 = vector.broadcast %cst_16 : f32 to vector<8x8x128xf32>
    %28 = arith.mulf %27, %24 : vector<8x8x128xf32>
    %29 = arith.select %26, %24, %28 : vector<8x8x128xi1>, vector<8x8x128xf32>
    %30 = vector.shape_cast %5 : vector<8x8xf32> to vector<8x8x1xf32>
    %cst_17 = arith.constant 0.000000e+00 : f32
    %31 = vector.broadcast %cst_17 : f32 to vector<8x8x1xf32>
    %32 = arith.cmpf ogt, %30, %31 : vector<8x8x1xf32>
    %cst_18 = arith.constant -1.000000e+30 : f32
    %33 = vector.shape_cast %32 : vector<8x8x1xi1> to vector<8x8x1xi1>
    %34 = vector.broadcast %33 : vector<8x8x1xi1> to vector<8x8x128xi1>
    %35 = vector.broadcast %cst_18 : f32 to vector<8x8x128xf32>
    %36 = arith.select %34, %29, %35 : vector<8x8x128xi1>, vector<8x8x128xf32>
    %cst_19 = arith.constant dense<0xFF800000> : vector<8x128xf32>
    %37 = vector.multi_reduction <maximumf>, %36, %cst_19 [1] : vector<8x8x128xf32> to vector<8x128xf32>
    %38 = vector.shape_cast %37 : vector<8x128xf32> to vector<8x1x128xf32>
    %39 = vector.broadcast %38 : vector<8x1x128xf32> to vector<8x8x128xf32>
    %40 = arith.subf %36, %39 : vector<8x8x128xf32>
    %41 = math.exp %40 : vector<8x8x128xf32>
    %42 = vector.broadcast %30 : vector<8x8x1xf32> to vector<8x8x128xf32>
    %43 = arith.mulf %41, %42 : vector<8x8x128xf32>
    %cst_20 = arith.constant dense<0.000000e+00> : vector<8x128xf32>
    %44 = vector.multi_reduction <add>, %43, %cst_20 [1] : vector<8x8x128xf32> to vector<8x128xf32>
    %45 = vector.shape_cast %44 : vector<8x128xf32> to vector<8x1x128xf32>
    %cst_21 = arith.constant 9.99999968E-21 : f32
    %46 = vector.broadcast %cst_21 : f32 to vector<8x1x128xf32>
    %47 = arith.maximumf %45, %46 : vector<8x1x128xf32>
    %48 = tpu.reciprocal %47 {approx = true} : vector<8x1x128xf32> -> vector<8x1x128xf32>
    %49 = vector.broadcast %48 : vector<8x1x128xf32> to vector<8x8x128xf32>
    %50 = arith.mulf %43, %49 : vector<8x8x128xf32>
    %51 = vector.shape_cast %10 : vector<8x128xf32> to vector<1x8x128xf32>
    %52 = vector.broadcast %51 : vector<1x8x128xf32> to vector<8x8x128xf32>
    %53 = arith.addf %52, %17 : vector<8x8x128xf32>
    %54 = arith.mulf %50, %53 : vector<8x8x128xf32>
    %cst_22 = arith.constant dense<0.000000e+00> : vector<8x128xf32>
    %55 = vector.multi_reduction <add>, %54, %cst_22 [1] : vector<8x8x128xf32> to vector<8x128xf32>
    %56 = arith.addf %55, %12 : vector<8x128xf32>
    %57 = vector.broadcast %16 : vector<1x128xf32> to vector<8x128xf32>
    %58 = arith.addf %56, %57 : vector<8x128xf32>
    %cst_23 = arith.constant 0.000000e+00 : f32
    %59 = vector.broadcast %cst_23 : f32 to vector<8x128xf32>
    %60 = arith.maximumf %58, %59 : vector<8x128xf32>
    %c0_24 = arith.constant 0 : index
    %c0_25 = arith.constant 0 : index
    %61 = vector.load %arg6[%c0_24, %c0_25] : memref<128x64xf32, #tpu.memory_space<vmem>>, vector<128x64xf32>
    %cst_26 = arith.constant dense<0.000000e+00> : vector<8x64xf32>
    %62 = tpu.matmul %60, %61, %cst_26 {dimension_numbers = #tpu.dot_dimension_numbers<[1], [0], [0], [1], [0, 0, 1, 1], [], []>} : vector<8x128xf32>, vector<128x64xf32>, vector<8x64xf32> -> vector<8x64xf32>
    %63 = vector.extract_strided_slice %62 {offsets = [0, 0], sizes = [8, 16], strides = [1, 1]} : vector<8x64xf32> to vector<8x16xf32>
    %64 = vector.extract_strided_slice %9 {offsets = [0, 256], sizes = [64, 16], strides = [1, 1]} : vector<64x288xf32> to vector<64x16xf32>
    %65 = vector.extract_strided_slice %62 {offsets = [0, 16], sizes = [8, 16], strides = [1, 1]} : vector<8x64xf32> to vector<8x16xf32>
    %66 = vector.extract_strided_slice %62 {offsets = [0, 32], sizes = [8, 16], strides = [1, 1]} : vector<8x64xf32> to vector<8x16xf32>
    %67 = vector.extract_strided_slice %62 {offsets = [0, 48], sizes = [8, 16], strides = [1, 1]} : vector<8x64xf32> to vector<8x16xf32>
    %68 = vector.extract_strided_slice %9 {offsets = [0, 272], sizes = [64, 16], strides = [1, 1]} : vector<64x288xf32> to vector<64x16xf32>
    %c1 = arith.constant 1 : index
    %c0_27 = arith.constant 0 : index
    %69 = vector.load %arg8[%c1, %c0_27] : memref<3x128xf32, #tpu.memory_space<vmem>>, vector<1x16xf32>
    %70 = vector.shape_cast %64 : vector<64x16xf32> to vector<8x8x16xf32>
    %71 = vector.shape_cast %68 : vector<64x16xf32> to vector<8x8x16xf32>
    %72 = vector.shape_cast %66 : vector<8x16xf32> to vector<1x8x16xf32>
    %73 = vector.broadcast %72 : vector<1x8x16xf32> to vector<8x8x16xf32>
    %74 = arith.addf %71, %73 : vector<8x8x16xf32>
    %75 = vector.shape_cast %67 : vector<8x16xf32> to vector<8x1x16xf32>
    %76 = vector.broadcast %75 : vector<8x1x16xf32> to vector<8x8x16xf32>
    %77 = arith.addf %74, %76 : vector<8x8x16xf32>
    %cst_28 = arith.constant 0.000000e+00 : f32
    %78 = vector.broadcast %cst_28 : f32 to vector<8x8x16xf32>
    %79 = arith.cmpf oge, %77, %78 : vector<8x8x16xf32>
    %cst_29 = arith.constant 2.000000e-01 : f32
    %80 = vector.broadcast %cst_29 : f32 to vector<8x8x16xf32>
    %81 = arith.mulf %80, %77 : vector<8x8x16xf32>
    %82 = arith.select %79, %77, %81 : vector<8x8x16xi1>, vector<8x8x16xf32>
    %83 = vector.shape_cast %5 : vector<8x8xf32> to vector<8x8x1xf32>
    %cst_30 = arith.constant 0.000000e+00 : f32
    %84 = vector.broadcast %cst_30 : f32 to vector<8x8x1xf32>
    %85 = arith.cmpf ogt, %83, %84 : vector<8x8x1xf32>
    %cst_31 = arith.constant -1.000000e+30 : f32
    %86 = vector.shape_cast %85 : vector<8x8x1xi1> to vector<8x8x1xi1>
    %87 = vector.broadcast %86 : vector<8x8x1xi1> to vector<8x8x16xi1>
    %88 = vector.broadcast %cst_31 : f32 to vector<8x8x16xf32>
    %89 = arith.select %87, %82, %88 : vector<8x8x16xi1>, vector<8x8x16xf32>
    %cst_32 = arith.constant dense<0xFF800000> : vector<8x16xf32>
    %90 = vector.multi_reduction <maximumf>, %89, %cst_32 [1] : vector<8x8x16xf32> to vector<8x16xf32>
    %91 = vector.shape_cast %90 : vector<8x16xf32> to vector<8x1x16xf32>
    %92 = vector.broadcast %91 : vector<8x1x16xf32> to vector<8x8x16xf32>
    %93 = arith.subf %89, %92 : vector<8x8x16xf32>
    %94 = math.exp %93 : vector<8x8x16xf32>
    %95 = vector.broadcast %83 : vector<8x8x1xf32> to vector<8x8x16xf32>
    %96 = arith.mulf %94, %95 : vector<8x8x16xf32>
    %cst_33 = arith.constant dense<0.000000e+00> : vector<8x16xf32>
    %97 = vector.multi_reduction <add>, %96, %cst_33 [1] : vector<8x8x16xf32> to vector<8x16xf32>
    %98 = vector.shape_cast %97 : vector<8x16xf32> to vector<8x1x16xf32>
    %cst_34 = arith.constant 9.99999968E-21 : f32
    %99 = vector.broadcast %cst_34 : f32 to vector<8x1x16xf32>
    %100 = arith.maximumf %98, %99 : vector<8x1x16xf32>
    %101 = tpu.reciprocal %100 {approx = true} : vector<8x1x16xf32> -> vector<8x1x16xf32>
    %102 = vector.broadcast %101 : vector<8x1x16xf32> to vector<8x8x16xf32>
    %103 = arith.mulf %96, %102 : vector<8x8x16xf32>
    %104 = vector.shape_cast %63 : vector<8x16xf32> to vector<1x8x16xf32>
    %105 = vector.broadcast %104 : vector<1x8x16xf32> to vector<8x8x16xf32>
    %106 = arith.addf %105, %70 : vector<8x8x16xf32>
    %107 = arith.mulf %103, %106 : vector<8x8x16xf32>
    %cst_35 = arith.constant dense<0.000000e+00> : vector<8x16xf32>
    %108 = vector.multi_reduction <add>, %107, %cst_35 [1] : vector<8x8x16xf32> to vector<8x16xf32>
    %109 = arith.addf %108, %65 : vector<8x16xf32>
    %110 = vector.broadcast %69 : vector<1x16xf32> to vector<8x16xf32>
    %111 = arith.addf %109, %110 : vector<8x16xf32>
    %cst_36 = arith.constant 0.000000e+00 : f32
    %112 = vector.broadcast %cst_36 : f32 to vector<8x16xf32>
    %113 = arith.maximumf %111, %112 : vector<8x16xf32>
    %cst_37 = arith.constant dense<0.000000e+00> : vector<8xf32>
    %114 = vector.multi_reduction <add>, %5, %cst_37 [1] : vector<8x8xf32> to vector<8xf32>
    %115 = vector.shape_cast %114 : vector<8xf32> to vector<8x1xf32>
    %cst_38 = arith.constant dense<0.000000e+00> : vector<8x16xf32>
    %116 = tpu.matmul %5, %113, %cst_38 {dimension_numbers = #tpu.dot_dimension_numbers<[1], [0], [0], [1], [0, 0, 1, 1], [], []>} : vector<8x8xf32>, vector<8x16xf32>, vector<8x16xf32> -> vector<8x16xf32>
    %cst_39 = arith.constant 1.000000e+00 : f32
    %117 = vector.broadcast %cst_39 : f32 to vector<8x1xf32>
    %118 = arith.maximumf %115, %117 : vector<8x1xf32>
    %119 = tpu.reciprocal %118 {approx = true} : vector<8x1xf32> -> vector<8x1xf32>
    %120 = vector.broadcast %119 : vector<8x1xf32> to vector<8x16xf32>
    %121 = arith.mulf %116, %120 : vector<8x16xf32>
    %c0_40 = arith.constant 0 : index
    %c0_41 = arith.constant 0 : index
    %122 = vector.load %arg7[%c0_40, %c0_41] : memref<16x256xf32, #tpu.memory_space<vmem>>, vector<16x256xf32>
    %123 = vector.extract_strided_slice %122 {offsets = [0, 0], sizes = [16, 128], strides = [1, 1]} : vector<16x256xf32> to vector<16x128xf32>
    %cst_42 = arith.constant dense<0.000000e+00> : vector<8x128xf32>
    %124 = tpu.matmul %113, %123, %cst_42 {dimension_numbers = #tpu.dot_dimension_numbers<[1], [0], [0], [1], [0, 0, 1, 1], [], []>} : vector<8x16xf32>, vector<16x128xf32>, vector<8x128xf32> -> vector<8x128xf32>
    %125 = vector.extract_strided_slice %122 {offsets = [0, 128], sizes = [16, 128], strides = [1, 1]} : vector<16x256xf32> to vector<16x128xf32>
    %cst_43 = arith.constant dense<0.000000e+00> : vector<8x128xf32>
    %126 = tpu.matmul %121, %125, %cst_43 {dimension_numbers = #tpu.dot_dimension_numbers<[1], [0], [0], [1], [0, 0, 1, 1], [], []>} : vector<8x16xf32>, vector<16x128xf32>, vector<8x128xf32> -> vector<8x128xf32>
    %127 = arith.addf %124, %126 : vector<8x128xf32>
    %c2 = arith.constant 2 : index
    %c0_44 = arith.constant 0 : index
    %128 = vector.load %arg8[%c2, %c0_44] : memref<3x128xf32, #tpu.memory_space<vmem>>, vector<1x128xf32>
    %129 = vector.broadcast %128 : vector<1x128xf32> to vector<8x128xf32>
    %130 = arith.addf %127, %129 : vector<8x128xf32>
    %131 = tpu.iota {dimensions = array<i32: 1>} : vector<8x128xi32>
    %c2_i32 = arith.constant 2 : i32
    %132 = vector.broadcast %c2_i32 : i32 to vector<8x128xi32>
    %133 = arith.cmpi slt, %131, %132 : vector<8x128xi32>
    %c2_i32_45 = arith.constant 2 : i32
    %134 = vector.broadcast %c2_i32_45 : i32 to vector<8x128xi32>
    %135 = arith.cmpi sge, %131, %134 : vector<8x128xi32>
    %c5_i32 = arith.constant 5 : i32
    %136 = vector.broadcast %c5_i32 : i32 to vector<8x128xi32>
    %137 = arith.cmpi slt, %131, %136 : vector<8x128xi32>
    %138 = arith.andi %135, %137 : vector<8x128xi1>
    %cst_46 = arith.constant -1.000000e+30 : f32
    %139 = vector.broadcast %cst_46 : f32 to vector<8x128xf32>
    %140 = arith.select %133, %130, %139 : vector<8x128xi1>, vector<8x128xf32>
    %cst_47 = arith.constant dense<0xFF800000> : vector<8xf32>
    %141 = vector.multi_reduction <maximumf>, %140, %cst_47 [1] : vector<8x128xf32> to vector<8xf32>
    %142 = vector.shape_cast %141 : vector<8xf32> to vector<8x1xf32>
    %cst_48 = arith.constant -1.000000e+30 : f32
    %143 = vector.broadcast %cst_48 : f32 to vector<8x128xf32>
    %144 = arith.select %138, %130, %143 : vector<8x128xi1>, vector<8x128xf32>
    %cst_49 = arith.constant dense<0xFF800000> : vector<8xf32>
    %145 = vector.multi_reduction <maximumf>, %144, %cst_49 [1] : vector<8x128xf32> to vector<8xf32>
    %146 = vector.shape_cast %145 : vector<8xf32> to vector<8x1xf32>
    %147 = arith.ori %133, %138 : vector<8x128xi1>
    %148 = vector.shape_cast %142 : vector<8x1xf32> to vector<8x1xf32>
    %149 = vector.broadcast %148 : vector<8x1xf32> to vector<8x128xf32>
    %150 = vector.shape_cast %146 : vector<8x1xf32> to vector<8x1xf32>
    %151 = vector.broadcast %150 : vector<8x1xf32> to vector<8x128xf32>
    %152 = arith.select %133, %149, %151 : vector<8x128xi1>, vector<8x128xf32>
    %153 = arith.subf %130, %152 : vector<8x128xf32>
    %cst_50 = arith.constant -1.000000e+30 : f32
    %154 = vector.broadcast %cst_50 : f32 to vector<8x128xf32>
    %155 = arith.select %147, %153, %154 : vector<8x128xi1>, vector<8x128xf32>
    %156 = math.exp %155 : vector<8x128xf32>
    %cst_51 = arith.constant 0.000000e+00 : f32
    %157 = vector.broadcast %cst_51 : f32 to vector<8x128xf32>
    %158 = arith.select %133, %156, %157 : vector<8x128xi1>, vector<8x128xf32>
    %cst_52 = arith.constant dense<0.000000e+00> : vector<8xf32>
    %159 = vector.multi_reduction <add>, %158, %cst_52 [1] : vector<8x128xf32> to vector<8xf32>
    %160 = vector.shape_cast %159 : vector<8xf32> to vector<8x1xf32>
    %cst_53 = arith.constant dense<0.000000e+00> : vector<8xf32>
    %161 = vector.multi_reduction <add>, %156, %cst_53 [1] : vector<8x128xf32> to vector<8xf32>
    %162 = vector.shape_cast %161 : vector<8xf32> to vector<8x1xf32>
    %163 = arith.subf %162, %160 : vector<8x1xf32>
    %164 = vector.shape_cast %160 : vector<8x1xf32> to vector<8x1xf32>
    %165 = vector.broadcast %164 : vector<8x1xf32> to vector<8x128xf32>
    %166 = vector.shape_cast %163 : vector<8x1xf32> to vector<8x1xf32>
    %167 = vector.broadcast %166 : vector<8x1xf32> to vector<8x128xf32>
    %168 = arith.select %133, %165, %167 : vector<8x128xi1>, vector<8x128xf32>
    %169 = arith.divf %156, %168 : vector<8x128xf32>
    %c0_54 = arith.constant 0 : index
    %c0_55 = arith.constant 0 : index
    %c0_56 = arith.constant 0 : index
    %170 = vector.load %arg9[%c0_54, %c0_55, %c0_56] : memref<1x8x128xf32, #tpu.memory_space<vmem>>, vector<1x8x128xf32>
    %171 = vector.shape_cast %170 : vector<1x8x128xf32> to vector<8x128xf32>
    %172 = vector.shape_cast %169 : vector<8x128xf32> to vector<1x8x128xf32>
    tpu.vector_store %arg9[%c0_54, %c0_55, %c0_56], %172 {strides = array<i32>} : memref<1x8x128xf32, #tpu.memory_space<vmem>>, vector<1x8x128xf32>,
    return
  }
  func.func @transform_0(%arg0: i32) -> (i32, i32, i32) {
    %c0_i32 = arith.constant 0 : i32
    %c0_i32_0 = arith.constant 0 : i32
    %c0_i32_1 = arith.constant 0 : i32
    return %arg0, %c0_i32, %c0_i32_0 : i32, i32, i32
  }
  func.func @transform_1(%arg0: i32) -> (i32, i32, i32) {
    %c0_i32 = arith.constant 0 : i32
    %c0_i32_0 = arith.constant 0 : i32
    %c0_i32_1 = arith.constant 0 : i32
    return %arg0, %c0_i32, %c0_i32_0 : i32, i32, i32
  }
  func.func @transform_2(%arg0: i32) -> (i32, i32, i32) {
    %c0_i32 = arith.constant 0 : i32
    %c0_i32_0 = arith.constant 0 : i32
    %c0_i32_1 = arith.constant 0 : i32
    return %arg0, %c0_i32, %c0_i32_0 : i32, i32, i32
  }
  func.func @transform_3(%arg0: i32) -> (i32, i32) {
    %c0_i32 = arith.constant 0 : i32
    %c0_i32_0 = arith.constant 0 : i32
    %c0_i32_1 = arith.constant 0 : i32
    return %c0_i32, %c0_i32_0 : i32, i32
  }
  func.func @transform_4(%arg0: i32) -> (i32, i32) {
    %c0_i32 = arith.constant 0 : i32
    %c0_i32_0 = arith.constant 0 : i32
    %c0_i32_1 = arith.constant 0 : i32
    return %c0_i32, %c0_i32_0 : i32, i32
  }
  func.func @transform_5(%arg0: i32) -> (i32, i32) {
    %c0_i32 = arith.constant 0 : i32
    %c0_i32_0 = arith.constant 0 : i32
    %c0_i32_1 = arith.constant 0 : i32
    return %c0_i32, %c0_i32_0 : i32, i32
  }
  func.func @transform_6(%arg0: i32) -> (i32, i32) {
    %c0_i32 = arith.constant 0 : i32
    %c0_i32_0 = arith.constant 0 : i32
    %c0_i32_1 = arith.constant 0 : i32
    return %c0_i32, %c0_i32_0 : i32, i32
  }
  func.func @transform_7(%arg0: i32) -> (i32, i32) {
    %c0_i32 = arith.constant 0 : i32
    %c0_i32_0 = arith.constant 0 : i32
    %c0_i32_1 = arith.constant 0 : i32
    return %c0_i32, %c0_i32_0 : i32, i32
  }
  func.func @transform_8(%arg0: i32) -> (i32, i32, i32) {
    %c0_i32 = arith.constant 0 : i32
    %c0_i32_0 = arith.constant 0 : i32
    %c0_i32_1 = arith.constant 0 : i32
    return %arg0, %c0_i32, %c0_i32_0 : i32, i32, i32
  }
}

</mosaic_0001>

<bundles_post_ra>
// kernel: model_forward.1
= control target key start
LH: loop header
LB: loop body
LE: loop exit
PB: predicated region body
PF: predicated region fallthrough
CT: control target
= control target key end

     0   :  { %s1881_s27 = smov 0   ;;  %s2422_s0 = inlined_call_operand.vmem [shape: f32[4,8,16], index: 0, kind: input, shape index: {}]   ;;  %s2423_s1 = inlined_call_operand.vmem [shape: f32[4,64,8], index: 1, kind: input, shape index: {}]   ;;  %s2424_s2 = inlined_call_operand.vmem [shape: f32[4,8,8], index: 2, kind: input, shape index: {}]   ;;  %s2425_s3 = inlined_call_operand.vmem [shape: f32[16,512], index: 3, kind: input, shape index: {}]   ;;  %s2426_s4 = inlined_call_operand.vmem [shape: f32[8,288], index: 4, kind: input, shape index: {}]   ;;  %s2427_s5 = inlined_call_operand.vmem [shape: f32[128,64], index: 5, kind: input, shape index: {}]   ;;  %s2428_s6 = inlined_call_operand.vmem [shape: f32[16,256], index: 6, kind: input, shape index: {}]   ;;  %s2429_s7 = inlined_call_operand.vmem [shape: f32[3,128], index: 7, kind: input, shape index: {}]   ;;  %s2430_s8 = inlined_call_operand.vmem [shape: f32[4,8,128], index: 8, kind: output, shape index: {}]  }
   0x1 LB: > { %s1693_s28 = sadd.s32 4294967295, %s1831_s27   ;;  %p1697_p0 = scmp.ge.s32.totalorder %s1831_s27, 1  ;;  %s1831_s27 = sphi %s1881_s27, %s18_s27  }
   0x2   : > { %p280_p1 = scmp.lt.s32.totalorder %s1831_s27, 5 }
   0x4   : > { %p281_p2 = pnand %p1697_p0, %p280_p1 }
   0x5   : > { %p321_p3 = scmp.lt.s32.totalorder (!%p281_p2), %s1693_s28, 3  ;;  %s1835_s17 = smov (!%p281_p2), 16  }
   0x6   : > { %284 = sbr.rel (%p281_p2) target bundleno = 1277 (0x4fd), region = 52 }
   0xb   : > { %v352_v0 = vld [vmem:[%s2425_s3 + $0x20] sm:$0xff]  ;;  %v353_v1 = vld [vmem:[%s2425_s3 + $0x28] sm:$0xff]  ;;  %v657_v3 = vlaneseq  ;;  %v354_v5 = vld [vmem:[%s2425_s3 + $0x30] sm:$0xff]  ;;  %s2442_s28 = smov (!%p321_p3, %s1693_s28), 3  ;;  %vm2431_vm0 = vcmask 130048   ;;  %vm2432_vm1 = vcmask 64512  }
   0xc   : > { %v348_v2 = vld [vmem:[%s2425_s3] sm:$0xff]  ;;  %374 = vmatpush.msra.mxu0 %v352_v0  ;;  %394 = vmatpush.msra.mxu1 %v353_v1  ;;  %v349_v4 = vld [vmem:[%s2425_s3 + $0x8] sm:$0xff]  ;;  %v355_v6 = vld [vmem:[%s2425_s3 + $0x38] sm:$0xff]  ;;  %s1920_s29 = sshll.u32 %s2442_s28, 3  ;;  %s1736_s11 = sshll.u32 %s2442_s28, 6 }
   0xd   : > { %414 = vmatpush.msra.mxu2 %v354_v5  ;;  %434 = vmatpush.msra.mxu3 %v355_v6  ;;  %v350_v7 = vld [vmem:[%s2425_s3 + $0x10] sm:$0xff]  ;;  %v351_v8 = vld [vmem:[%s2425_s3 + $0x18] sm:$0xff]  ;;  %v440_v9 = vld [vmem:[%s2426_s4] sm:$0xff]  ;;  %v658_v10 = vshrl.u32 %v657_v3, 7  ;;  %s324_s10 = scalar_lea.vmem %s2422_s0, %s1920_s29  ;;  %s1930_s14 = scalar_lea.vmem %s2424_s2, %s1920_s29 }
   0xe   : > { %375 = vmatpush.msra.mxu0 %v348_v2  ;;  %395 = vmatpush.msra.mxu1 %v349_v4  ;;  %v441_v11 = vld [vmem:[%s2426_s4 + $0x8] sm:$0xff]  ;;  %v338_v12 = vld [vmem:[%s324_s10] sm:$0xff]  ;;  %s1940_s16 = scalar_lea.vmem %s2423_s1, %s1736_s11  ;;  %s1833_s28 = smov 112  }
   0xf   : > { %415 = vmatpush.msra.mxu2 %v350_v7  ;;  %435 = vmatpush.msra.mxu3 %v351_v8  ;;  %v347_v13 = vld [vmem:[%s1930_s14] sm:$0xff]  ;;  %v1950_v18 = vld [vmem:[%s1940_s16 + $0x8] sm:$0xff]  ;;  %v1957_v20 = vld [vmem:[%s1940_s16 + $0x10] sm:$0xff]  ;;  %s337_s12 = scalar_lea.vmem %s2430_s8, %s1920_s29 }
  0x10   : > { %483 = vmatpush.msrb.mxu0 %v440_v9  ;;  %524 = vmatpush.msrb.mxu1 %v441_v11  ;;  %v656_v14 = vperm.slane %v347_v13, 0  ;;  %v663_v15 = vperm.slane %v347_v13, 1  ;;  %v1943_v16 = vld [vmem:[%s1940_s16] sm:$0xff]  ;;  %v670_v17 = vperm.slane %v347_v13, 2  ;;  %v677_v19 = vperm.slane %v347_v13, 3  ;;  %v1964_v22 = vld [vmem:[%s1940_s16 + $0x18] sm:$0xff] }
  0x11   : > { %1749 = vset.pattern.permute.xlu1 %v658_v10  ;;  %1748 = vset.pattern.permute.xlu0 %v658_v10  ;;  %v698_v21 = vperm.slane %v347_v13, 6  ;;  %v705_v23 = vperm.slane %v347_v13, 7  ;;  %v684_v24 = vperm.slane %v347_v13, 4  ;;  %v1971_v25 = vld [vmem:[%s1940_s16 + $0x20] sm:$0xff]  ;;  %v691_v26 = vperm.slane %v347_v13, 5  ;;  %v1978_v27 = vld [vmem:[%s1940_s16 + $0x28] sm:$0xff] }
  0x12   : > { %1703 = vmatmul.msk.f32.vlgmr.msra.gmra.mxu0 %vm2431_vm0, %v338_v12  ;;  %1704 = vmatmul.msk.f32.vlgmr.msra.gmra.mxu1 %vm2431_vm0, %v338_v12  ;;  %v1985_v28 = vld [vmem:[%s1940_s16 + $0x30] sm:$0xff]  ;;  %v1992_v29 = vld [vmem:[%s1940_s16 + $0x38] sm:$0xff]  ;;  %s1834_s16 = smov 96  }
  0x13   : > { %1705 = vmatmul.msk.f32.vlgmr.msra.gmra.mxu2 %vm2431_vm0, %v338_v12  ;;  %1706 = vmatmul.msk.f32.vlgmr.msra.gmra.mxu3 %vm2431_vm0, %v338_v12  ;;  %vm2433_vm0 = vcmask 1047559  }
  0x14   : > { %1750 = vset.pattern.permute.xlu2 %v658_v10 }
  0x19   : > { %661 = vperm.xlu1 %1749, %v656_v14   ;;  %668 = vperm.xlu0 %1748, %v663_v15  }
  0x1a   : > { %1707 = vmatmul.msk.f32.vlgmr.msrb.gmra.mxu0 %vm2432_vm1, %v1943_v16  ;;  %1715 = vmatmul.msk.f32.vlgmr.msrb.gmra.mxu1 %vm2432_vm1, %v1943_v16 }
  0x1c   : > { %689 = vperm.xlu2 %1750, %v684_v24  }
  0x21   : > { %675 = vperm.xlu0 %1748, %v670_v17   ;;  %682 = vperm.xlu1 %1749, %v677_v19  }
  0x22   : > { %1708 = vmatmul.msk.f32.gmra.mxu0 %vm2432_vm1, %v1950_v18  ;;  %1716 = vmatmul.msk.f32.gmra.mxu1 %vm2432_vm1, %v1950_v18 }
  0x24   : > { %696 = vperm.xlu2 %1750, %v691_v26  }
  0x29   : > { %703 = vperm.xlu0 %1748, %v698_v21   ;;  %710 = vperm.xlu1 %1749, %v705_v23  }
  0x2a   : > { %1709 = vmatmul.msk.f32.gmra.mxu0 %vm2432_vm1, %v1957_v20  ;;  %1717 = vmatmul.msk.f32.gmra.mxu1 %vm2432_vm1, %v1957_v20 }
  0x32   : > { %1710 = vmatmul.msk.f32.gmra.mxu0 %vm2432_vm1, %v1964_v22  ;;  %1718 = vmatmul.msk.f32.gmra.mxu1 %vm2432_vm1, %v1964_v22 }
  0x3a   : > { %1711 = vmatmul.msk.f32.gmra.mxu0 %vm2432_vm1, %v1971_v25  ;;  %1719 = vmatmul.msk.f32.gmra.mxu1 %vm2432_vm1, %v1971_v25 }
  0x42   : > { %1712 = vmatmul.msk.f32.gmra.mxu0 %vm2432_vm1, %v1978_v27  ;;  %1720 = vmatmul.msk.f32.gmra.mxu1 %vm2432_vm1, %v1978_v27 }
  0x4a   : > { %1713 = vmatmul.msk.f32.gmra.mxu0 %vm2432_vm1, %v1985_v28  ;;  %1721 = vmatmul.msk.f32.gmra.mxu1 %vm2432_vm1, %v1985_v28 }
  0x52   : > { %1714 = vmatmul.msk.f32.gmra.mxu0 %vm2432_vm1, %v1992_v29  ;;  %1722 = vmatmul.msk.f32.gmra.mxu1 %vm2432_vm1, %v1992_v29 }
  0x8b   : > { %v2006_v36 = vpop.permute.xlu1 %661  ;;  %v2012_v44 = vpop.permute.xlu0 %668 }
  0x8c   : > { %vm712_vm3 = vcmp.gt.f32.partialorder %v2006_v36, 0.0  ;;  %vm713_vm5 = vcmp.gt.f32.partialorder %v2012_v44, 0.0 }
  0x8f   : > { %v1998_v30 = vpop.f32.mrf.mxu1  ;;  %v2030_v23 = vpop.f32.mrf.mxu0 }
  0x93   : > { %v2020_v58 = vpop.permute.xlu0 %675  ;;  %v2027_v13 = vpop.permute.xlu1 %682 }
  0x94   : > { %vm714_vm7 = vcmp.gt.f32.partialorder %v2020_v58, 0.0  ;;  %vm715_vm9 = vcmp.gt.f32.partialorder %v2027_v13, 0.0 }
  0x96   : > { %v2000_v31 = vpop.f32.mrf.mxu2  ;;  %v2002_v32 = vpop.f32.mrf.mxu3 }
  0x97   : > { %v526_v33 = vpop.f32.mrf.mxu1  ;;  %v608_v34 = vperm.slane %v2002_v32, 0  ;;  %v601_v38 = vrot.slane %v2002_v32, 1  ;;  %v602_v48 = vrot.slane %v2002_v32, 2  ;;  %v603_v62 = vrot.slane %v2002_v32, 3 }
  0x98   : > { %v592_v35 = vadd.f32 %v526_v33, %v2000_v31  ;;  %v604_v17 = vrot.slane %v2002_v32, 4 }
  0x99   : > { %v609_v41 = vperm.slane %v601_v38, 0  ;;  %v610_v52 = vperm.slane %v602_v48, 0  ;;  %v611_v7 = vperm.slane %v603_v62, 0 }
  0x9a   : > { %v624_v37 = vadd.f32 %v608_v34, %v592_v35  ;;  %v612_v38 = vperm.slane %v604_v17, 0 }
  0x9c   : > { %vm632_vm2 = vcmp.ge.f32.partialorder %v624_v37, 0.0  ;;  %v640_v39 = vmul.f32 0.2, %v624_v37 }
  0x9e   : > { %v648_v40 = vsel %vm632_vm2, %v624_v37, %v640_v39 }
  0x9f   : > { %v736_v42 = vsel %vm712_vm3, %v648_v40, -1e+30  ;;  %v529_v43 = vpop.f32.mrf.mxu1 }
  0xa0   : > { %v744_v45 = vrot.slane %v736_v42, 4  ;;  %v593_v46 = vadd.f32 %v529_v43, %v2000_v31 }
  0xa2   : > { %v625_v47 = vadd.f32 %v609_v41, %v593_v46  ;;  %v745_v49 = vmax.f32 %v736_v42, %v744_v45  ;;  %v2035_v41 = vpop.permute.xlu2 %689 }
  0xa3   : > { %vm716_vm11 = vcmp.gt.f32.partialorder %v2035_v41, 0.0 }
  0xa4   : > { %vm633_vm4 = vcmp.ge.f32.partialorder %v625_v47, 0.0  ;;  %v641_v50 = vmul.f32 0.2, %v625_v47  ;;  %v746_v53 = vrot.slane %v745_v49, 2 }
  0xa6   : > { %v649_v51 = vsel %vm633_vm4, %v625_v47, %v641_v50  ;;  %v747_v61 = vmax.f32 %v745_v49, %v746_v53  ;;  %v605_v47 = vrot.slane %v2002_v32, 5 }
  0xa7   : > { %v737_v54 = vsel %vm713_vm5, %v649_v51, -1e+30  ;;  %v532_v55 = vpop.f32.mrf.mxu1 }
  0xa8   : > { %v750_v56 = vrot.slane %v737_v54, 4  ;;  %v594_v57 = vadd.f32 %v532_v55, %v2000_v31  ;;  %v748_v4 = vrot.slane %v747_v61, 1 }
  0xaa   : > { %v751_v59 = vmax.f32 %v737_v54, %v750_v56  ;;  %v626_v60 = vadd.f32 %v610_v52, %v594_v57  ;;  %v749_v14 = vmax.f32 %v747_v61, %v748_v4  ;;  %v2040_v56 = vpop.f32.mrf.mxu0  ;;  %v2048_v4 = vpop.permute.xlu2 %696 }
  0xab   : > { %vm717_vm13 = vcmp.gt.f32.partialorder %v2048_v4, 0.0 }
  0xac   : > { %v752_v63 = vrot.slane %v751_v59, 2  ;;  %vm634_vm6 = vcmp.ge.f32.partialorder %v626_v60, 0.0  ;;  %v642_v0 = vmul.f32 0.2, %v626_v60  ;;  %v792_v34 = vsub.f32 %v736_v42, %v749_v14 }
  0xae   : > { %v753_v1 = vmax.f32 %v751_v59, %v752_v63  ;;  %v650_v2 = vsel %vm634_vm6, %v626_v60, %v642_v0  ;;  %v800_v48 = vmul.f32 1.442695, %v792_v34  ;;  %vm1026_vm6 = vcmask 1041409  }
  0xaf   : > { %v738_v5 = vsel %vm714_vm7, %v650_v2, -1e+30  ;;  %v535_v6 = vpop.f32.mrf.mxu1 }
  0xb0   : > { %v754_v8 = vrot.slane %v753_v1, 1  ;;  %v756_v9 = vrot.slane %v738_v5, 4  ;;  %v595_v10 = vadd.f32 %v535_v6, %v2000_v31 }
  0xb2   : > { %v755_v11 = vmax.f32 %v753_v1, %v754_v8  ;;  %v757_v12 = vmax.f32 %v738_v5, %v756_v9  ;;  %v627_v15 = vadd.f32 %v611_v7, %v595_v10 }
  0xb4   : > { %v793_v19 = vsub.f32 %v737_v54, %v755_v11  ;;  %v758_v21 = vrot.slane %v757_v12, 2  ;;  %vm635_vm8 = vcmp.ge.f32.partialorder %v627_v15, 0.0  ;;  %v643_v24 = vmul.f32 0.2, %v627_v15 }
  0xb5   : > { %v613_v54 = vperm.slane %v605_v47, 0 }
  0xb6   : > { %v802_v26 = vmul.f32 1.442695, %v793_v19  ;;  %v759_v33 = vmax.f32 %v757_v12, %v758_v21  ;;  %v651_v35 = vsel %vm635_vm8, %v627_v15, %v643_v24  ;;  %vm1029_vm8 = vcmask 1042434  }
  0xb7   : > { %v538_v37 = vpop.f32.mrf.mxu1  ;;  %v739_v40 = vsel %vm715_vm9, %v651_v35, -1e+30 }
  0xb8   : > { %v760_v39 = vrot.slane %v759_v33, 1  ;;  %1754 = vpow2.f32 %v802_v26  ;;  %v762_v43 = vrot.slane %v739_v40, 4  ;;  %v596_v45 = vadd.f32 %v538_v37, %v2000_v31  ;;  %v442_v37 = vld [vmem:[%s2426_s4 + $0x10] sm:$0xff] }
  0xb9   : > { %1756 = vpow2.f32 %v800_v48  ;;  %565 = vmatpush.msrb.mxu2 %v442_v37  ;;  %v2072_v48 = vpop.permute.xlu0 %703 }
  0xba   : > { %v761_v46 = vmax.f32 %v759_v33, %v760_v39  ;;  %v763_v49 = vmax.f32 %v739_v40, %v762_v43  ;;  %v628_v50 = vadd.f32 %v612_v38, %v596_v45  ;;  %v2065_v38 = vpop.f32.mrf.mxu0  ;;  %1723 = vmatmul.msk.f32.vlgmr.msrb.gmra.mxu2 %vm2432_vm1, %v1943_v16  ;;  %vm718_vm15 = vcmp.gt.f32.partialorder %v2072_v48, 0.0 }
  0xbc   : > { %v794_v42 = vsub.f32 %v738_v5, %v761_v46  ;;  %v764_v51 = vrot.slane %v763_v49, 2  ;;  %vm636_vm10 = vcmp.ge.f32.partialorder %v628_v50, 0.0  ;;  %v644_v52 = vmul.f32 0.2, %v628_v50 }
  0xbd   : > { %v606_v5 = vrot.slane %v2002_v32, 6 }
  0xbe   : > { %v804_v53 = vmul.f32 1.442695, %v794_v42  ;;  %v1755_v55 = vpop.eup %1754  ;;  %v765_v57 = vmax.f32 %v763_v49, %v764_v51  ;;  %v652_v59 = vsel %vm636_vm10, %v628_v50, %v644_v52  ;;  %vm1032_vm10 = vcmask 1043459  }
  0xbf   : > { %v541_v60 = vpop.f32.mrf.mxu1  ;;  %v740_v61 = vsel %vm716_vm11, %v652_v59, -1e+30  ;;  %v2046_v1 = vmul.f32 %v1755_v55, %v2012_v44  ;;  %v1757_v9 = vpop.eup %1756  ;;  %v614_v17 = vperm.slane %v606_v5, 0 }
  0xc0   : > { %1758 = vpow2.f32 %v804_v53  ;;  %v597_v62 = vadd.f32 %v541_v60, %v2000_v31  ;;  %v766_v63 = vrot.slane %v765_v57, 1  ;;  %v768_v0 = vrot.slane %v740_v61, 4 }
  0xc1   : > { %v830_v14 = vrot.slane %v2046_v1, 4  ;;  %v2057_v26 = vmul.f32 %v1757_v9, %v2006_v36  ;;  %v607_v53 = vrot.slane %v2002_v32, 7 }
  0xc2   : > { %v629_v2 = vadd.f32 %v613_v54, %v597_v62  ;;  %v767_v6 = vmax.f32 %v765_v57, %v766_v63  ;;  %v769_v7 = vmax.f32 %v740_v61, %v768_v0  ;;  %1724 = vmatmul.msk.f32.gmra.mxu2 %vm2432_vm1, %v1950_v18 }
  0xc3   : > { %v831_v43 = vadd.f32 %v830_v14, %v2046_v1  ;;  %v824_v50 = vrot.slane %v2057_v26, 4 }
  0xc4   : > { %vm637_vm12 = vcmp.ge.f32.partialorder %v629_v2, 0.0  ;;  %v645_v8 = vmul.f32 0.2, %v629_v2  ;;  %v795_v10 = vsub.f32 %v739_v40, %v767_v6  ;;  %v770_v11 = vrot.slane %v769_v7, 2 }
  0xc5   : > { %v832_v54 = vrot.slane %v831_v43, 2  ;;  %v825_v0 = vadd.f32 %v824_v50, %v2057_v26 }
  0xc6   : > { %v1759_v12 = vpop.eup %1758  ;;  %v653_v15 = vsel %vm637_vm12, %v629_v2, %v645_v8  ;;  %v806_v21 = vmul.f32 1.442695, %v795_v10  ;;  %v771_v33 = vmax.f32 %v769_v7, %v770_v11  ;;  %v615_v7 = vperm.slane %v607_v53, 0  ;;  %v2087_v11 = vpop.f32.mrf.mxu0 }
  0xc7   : > { %v2054_v19 = vmul.f32 %v1759_v12, %v2020_v58  ;;  %v544_v24 = vpop.f32.mrf.mxu1  ;;  %v741_v34 = vsel %vm717_vm13, %v653_v15, -1e+30  ;;  %v833_v8 = vadd.f32 %v832_v54, %v831_v43  ;;  %vm1035_vm12 = vcmask 1044484  }
  0xc8   : > { %v598_v35 = vadd.f32 %v544_v24, %v2000_v31  ;;  %1760 = vpow2.f32 %v806_v21  ;;  %v774_v40 = vrot.slane %v741_v34, 4  ;;  %v772_v45 = vrot.slane %v771_v33, 1 }
  0xc9   : > { %v836_v39 = vrot.slane %v2054_v19, 4  ;;  %v834_v37 = vrot.slane %v833_v8, 1 }
  0xca   : > { %v630_v46 = vadd.f32 %v614_v17, %v598_v35  ;;  %v775_v49 = vmax.f32 %v741_v34, %v774_v40  ;;  %v773_v42 = vmax.f32 %v771_v33, %v772_v45  ;;  %v826_v17 = vrot.slane %v825_v0, 2  ;;  %1725 = vmatmul.msk.f32.gmra.mxu2 %vm2432_vm1, %v1957_v20 }
  0xcb   : > { %v837_v47 = vadd.f32 %v836_v39, %v2054_v19 }
  0xcc   : > { %vm638_vm14 = vcmp.ge.f32.partialorder %v630_v46, 0.0  ;;  %v646_v51 = vmul.f32 0.2, %v630_v46  ;;  %v776_v52 = vrot.slane %v775_v49, 2  ;;  %v796_v55 = vsub.f32 %v740_v61, %v773_v42 }
  0xcd   : > { %v838_v16 = vrot.slane %v837_v47, 2 }
  0xce   : > { %v654_v57 = vsel %vm638_vm14, %v630_v46, %v646_v51  ;;  %v1761_v59 = vpop.eup %1760  ;;  %v777_v60 = vmax.f32 %v775_v49, %v776_v52  ;;  %v808_v5 = vmul.f32 1.442695, %v796_v55  ;;  %v827_v49 = vadd.f32 %v826_v17, %v825_v0 }
  0xcf   : > { %v742_v62 = vsel %vm718_vm15, %v654_v57, -1e+30  ;;  %v547_v63 = vpop.f32.mrf.mxu1  ;;  %v2081_v2 = vmul.f32 %v1761_v59, %v2027_v13  ;;  %v839_v12 = vadd.f32 %v838_v16, %v837_v47  ;;  %v835_v51 = vadd.f32 %v834_v37, %v833_v8 }
  0xd0   : > { %v780_v6 = vrot.slane %v742_v62, 4  ;;  %v778_v32 = vrot.slane %v777_v60, 1  ;;  %v599_v61 = vadd.f32 %v547_v63, %v2000_v31  ;;  %1762 = vpow2.f32 %v808_v5  ;;  %v2090_v31 = vpop.permute.xlu1 %710  ;;  %v2101_v63 = vpop.f32.mrf.mxu0 }
  0xd1   : > { %v842_v9 = vrot.slane %v2081_v2, 4  ;;  %v840_v43 = vrot.slane %v839_v12, 1  ;;  %vm719_vm4 = vcmp.gt.f32.partialorder %v2090_v31, 0.0  ;;  %v828_v59 = vrot.slane %v827_v49, 1 }
  0xd2   : > { %v781_v10 = vmax.f32 %v742_v62, %v780_v6  ;;  %v779_v14 = vmax.f32 %v777_v60, %v778_v32  ;;  %v631_v15 = vadd.f32 %v615_v7, %v599_v61  ;;  %v873_v6 = vmax.f32 %v835_v51, 1e-20  ;;  %1726 = vmatmul.msk.f32.gmra.mxu2 %vm2432_vm1, %v1964_v22  ;;  %v1014_v22 = vld [vmem:[%s2427_s5 + $0x68] sm:$0xff] }
  0xd3   : > { %v843_v21 = vadd.f32 %v842_v9, %v2081_v2  ;;  %v841_v54 = vadd.f32 %v840_v43, %v839_v12  ;;  %v1013_v43 = vld [vmem:[%s2427_s5 + $0x60] sm:$0xff]  ;;  %vm1038_vm14 = vcmask 1045509  }
  0xd4   : > { %v782_v24 = vrot.slane %v781_v10, 2  ;;  %v797_v33 = vsub.f32 %v741_v34, %v779_v14  ;;  %vm639_vm2 = vcmp.ge.f32.partialorder %v631_v15, 0.0  ;;  %v647_v35 = vmul.f32 0.2, %v631_v15 }
  0xd5   : > { %v844_v39 = vrot.slane %v843_v21, 2  ;;  %v874_v61 = vmax.f32 %v841_v54, 1e-20 }
  0xd6   : > { %v783_v40 = vmax.f32 %v781_v10, %v782_v24  ;;  %v810_v45 = vmul.f32 1.442695, %v797_v33  ;;  %v655_v18 = vsel %vm639_vm2, %v631_v15, %v647_v35  ;;  %v1763_v46 = vpop.eup %1762  ;;  %v829_v10 = vadd.f32 %v828_v59, %v827_v49  ;;  %v1015_v35 = vld [vmem:[%s2427_s5 + $0x70] sm:$0xff] }
  0xd7   : > { %v845_v47 = vadd.f32 %v844_v39, %v843_v21  ;;  %v2094_v42 = vmul.f32 %v1763_v46, %v2035_v41  ;;  %v743_v34 = vsel %vm719_vm4, %v655_v18, -1e+30  ;;  %vm2434_vm2 = vcmask 1046534  }
  0xd8   : > { %v784_v50 = vrot.slane %v783_v40, 1  ;;  %1764 = vpow2.f32 %v810_v45  ;;  %v786_v57 = vrot.slane %v743_v34, 4  ;;  %v872_v33 = vmax.f32 %v829_v10, 1e-20  ;;  %v497_v18 = vpop.f32.mrf.mxu0 }
  0xd9   : > { %v846_v52 = vrot.slane %v845_v47, 1  ;;  %v848_v55 = vrot.slane %v2094_v42, 4 }
  0xda   : > { %v785_v53 = vmax.f32 %v783_v40, %v784_v50  ;;  %v787_v5 = vmax.f32 %v743_v34, %v786_v57  ;;  %1727 = vmatmul.msk.f32.gmra.mxu2 %vm2432_vm1, %v1971_v25  ;;  %v897_v25 = vadd.f32 %v2065_v38, %v2030_v23 }
  0xdb   : > { %v847_v16 = vadd.f32 %v846_v52, %v845_v47  ;;  %v849_v0 = vadd.f32 %v848_v55, %v2094_v42  ;;  %v1012_v52 = vld [vmem:[%s2427_s5 + $0x58] sm:$0xff] }
  0xdc   : > { %v798_v60 = vsub.f32 %v742_v62, %v785_v53  ;;  %v788_v9 = vrot.slane %v787_v5, 2  ;;  %v1016_v62 = vld [vmem:[%s2427_s5 + $0x78] sm:$0xff] }
  0xdd   : > { %v850_v7 = vrot.slane %v849_v0, 2  ;;  %v875_v20 = vmax.f32 %v847_v16, 1e-20  ;;  %1047 = vmatpush.msrb.mxu3 %v1016_v62 }
  0xde   : > { %v1765_v32 = vpop.eup %1764  ;;  %v812_v8 = vmul.f32 1.442695, %v798_v60  ;;  %v789_v15 = vmax.f32 %v787_v5, %v788_v9 }
  0xdf   : > { %v851_v12 = vadd.f32 %v850_v7, %v849_v0  ;;  %v2105_v14 = vmul.f32 %v1765_v32, %v2048_v4  ;;  %1048 = vmatpush.msrb.mxu3 %v1015_v35 }
  0xe0   : > { %1766 = vpow2.f32 %v812_v8  ;;  %v790_v24 = vrot.slane %v789_v15, 1 }
  0xe1   : > { %1768 = vrcp.f32 %v873_v6  ;;  %v852_v17 = vrot.slane %v851_v12, 1  ;;  %v854_v21 = vrot.slane %v2105_v14, 4  ;;  %1049 = vmatpush.msrb.mxu3 %v1014_v22  ;;  %v1010_v6 = vld [vmem:[%s2427_s5 + $0x48] sm:$0xff] }
  0xe2   : > { %1770 = vrcp.f32 %v874_v61  ;;  %v791_v40 = vmax.f32 %v789_v15, %v790_v24  ;;  %1728 = vmatmul.msk.f32.gmra.mxu2 %vm2432_vm1, %v1978_v27 }
  0xe3   : > { %1772 = vrcp.f32 %v875_v20  ;;  %v853_v37 = vadd.f32 %v852_v17, %v851_v12  ;;  %v855_v39 = vadd.f32 %v854_v21, %v2105_v14  ;;  %1050 = vmatpush.msrb.mxu3 %v1013_v43  ;;  %v899_v20 = vadd.f32 %v2101_v63, %v2030_v23 }
  0xe4   : > { %v799_v47 = vsub.f32 %v743_v34, %v791_v40  ;;  %1774 = vrcp.f32 %v872_v33  ;;  %v1011_v34 = vld [vmem:[%s2427_s5 + $0x50] sm:$0xff]  ;;  %v500_v33 = vpop.f32.mrf.mxu0 }
  0xe5   : > { %v876_v46 = vmax.f32 %v853_v37, 1e-20  ;;  %v856_v49 = vrot.slane %v855_v39, 2  ;;  %1051 = vmatpush.msrb.mxu3 %v1012_v52  ;;  %v896_v37 = vadd.f32 %v2040_v56, %v2030_v23  ;;  %v1005_v56 = vld [vmem:[%s2427_s5 + $0x20] sm:$0xff] }
  0xe6   : > { %v1767_v45 = vpop.eup %1766  ;;  %v814_v55 = vmul.f32 1.442695, %v799_v47 }
  0xe7   : > { %v1769_v50 = vpop.eup %1768  ;;  %v2124_v51 = vmul.f32 %v1767_v45, %v2072_v48  ;;  %1776 = vrcp.f32 %v876_v46  ;;  %v857_v54 = vadd.f32 %v856_v49, %v855_v39  ;;  %1052 = vmatpush.msrb.mxu3 %v1011_v34  ;;  %v1006_v45 = vld [vmem:[%s2427_s5 + $0x28] sm:$0xff] }
  0xe8   : > { %v1771_v53 = vpop.eup %1770  ;;  %v889_v16 = vmul.f32 %v1769_v50, %v2046_v1  ;;  %1778 = vpow2.f32 %v814_v55  ;;  %v898_v1 = vadd.f32 %v2087_v11, %v2030_v23  ;;  %v1008_v11 = vld [vmem:[%s2427_s5 + $0x38] sm:$0xff] }
  0xe9   : > { %v1773_v57 = vpop.eup %1772  ;;  %v860_v59 = vrot.slane %v2124_v51, 4  ;;  %v858_v60 = vrot.slane %v857_v54, 1  ;;  %v890_v0 = vmul.f32 %v1771_v53, %v2054_v19  ;;  %v1009_v19 = vld [vmem:[%s2427_s5 + $0x40] sm:$0xff]  ;;  %1053 = vmatpush.msrb.mxu3 %v1010_v6  ;;  %v901_v53 = vadd.f32 %v500_v33, %v2030_v23  ;;  %v1003_v6 = vld [vmem:[%s2427_s5 + $0x10] sm:$0xff] }
  0xea   : > { %v891_v32 = vmul.f32 %v1773_v57, %v2081_v2  ;;  %v1775_v7 = vpop.eup %1774  ;;  %v905_v10 = vmul.f32 %v897_v25, %v889_v16  ;;  %v900_v2 = vadd.f32 %v497_v18, %v2030_v23  ;;  %1729 = vmatmul.msk.f32.gmra.mxu2 %vm2432_vm1, %v1985_v28 }
  0xeb   : > { %v861_v5 = vadd.f32 %v860_v59, %v2124_v51  ;;  %v859_v61 = vadd.f32 %v858_v60, %v857_v54  ;;  %v906_v38 = vmul.f32 %v898_v1, %v890_v0  ;;  %v888_v21 = vmul.f32 %v1775_v7, %v2057_v26  ;;  %1054 = vmatpush.msrb.mxu3 %v1009_v19  ;;  %v1004_v59 = vld [vmem:[%s2427_s5 + $0x18] sm:$0xff]  ;;  %v1002_v1 = vld [vmem:[%s2427_s5 + $0x8] sm:$0xff] }
  0xec   : > { %v907_v24 = vmul.f32 %v899_v20, %v891_v32  ;;  %v918_v26 = vrot.slane %v905_v10, 4  ;;  %v503_v25 = vpop.f32.mrf.mxu0 }
  0xed   : > { %v862_v8 = vrot.slane %v861_v5, 2  ;;  %v1777_v9 = vpop.eup %1776  ;;  %v877_v12 = vmax.f32 %v859_v61, 1e-20  ;;  %1055 = vmatpush.msrb.mxu3 %v1008_v11  ;;  %v924_v39 = vrot.slane %v906_v38, 4  ;;  %v904_v18 = vmul.f32 %v896_v37, %v888_v21 }
  0xee   : > { %v892_v15 = vmul.f32 %v1777_v9, %v2094_v42  ;;  %v1779_v17 = vpop.eup %1778  ;;  %v1007_v42 = vld [vmem:[%s2427_s5 + $0x30] sm:$0xff]  ;;  %v930_v46 = vrot.slane %v907_v24, 4  ;;  %v919_v52 = vadd.f32 %v918_v26, %v905_v10 }
  0xef   : > { %v863_v62 = vadd.f32 %v862_v8, %v861_v5  ;;  %1780 = vrcp.f32 %v877_v12  ;;  %v2158_v22 = vmul.f32 %v1779_v17, %v2090_v31  ;;  %1056 = vmatpush.msrb.mxu3 %v1007_v42  ;;  %v925_v54 = vadd.f32 %v924_v39, %v906_v38  ;;  %v1001_v12 = vld [vmem:[%s2427_s5] sm:$0xff] }
  0xf0   : > { %v908_v63 = vmul.f32 %v900_v2, %v892_v15  ;;  %v912_v34 = vrot.slane %v904_v18, 4  ;;  %v931_v16 = vadd.f32 %v930_v46, %v907_v24  ;;  %v902_v2 = vadd.f32 %v503_v25, %v2030_v23 }
  0xf1   : > { %v864_v35 = vrot.slane %v863_v62, 1  ;;  %v866_v43 = vrot.slane %v2158_v22, 4  ;;  %1057 = vmatpush.msrb.mxu3 %v1006_v45  ;;  %v926_v32 = vrot.slane %v925_v54, 2 }
  0xf2   : > { %v936_v27 = vrot.slane %v908_v63, 4  ;;  %v913_v8 = vadd.f32 %v912_v34, %v904_v18  ;;  %v932_v19 = vrot.slane %v931_v16, 2  ;;  %1730 = vmatmul.msk.f32.gmra.mxu2 %vm2432_vm1, %v1992_v29 }
  0xf3   : > { %v865_v40 = vadd.f32 %v864_v35, %v863_v62  ;;  %v867_v47 = vadd.f32 %v866_v43, %v2158_v22  ;;  %1058 = vmatpush.msrb.mxu3 %v1005_v56  ;;  %v927_v62 = vadd.f32 %v926_v32, %v925_v54 }
  0xf4   : > { %v937_v60 = vadd.f32 %v936_v27, %v908_v63  ;;  %v914_v21 = vrot.slane %v913_v8, 2  ;;  %v933_v24 = vadd.f32 %v932_v19, %v931_v16  ;;  %v506_v43 = vpop.f32.mrf.mxu0 }
  0xf5   : > { %v878_v49 = vmax.f32 %v865_v40, 1e-20  ;;  %v1781_v50 = vpop.eup %1780  ;;  %v868_v57 = vrot.slane %v867_v47, 2  ;;  %1059 = vmatpush.msrb.mxu3 %v1004_v59  ;;  %v928_v26 = vrot.slane %v927_v62, 1 }
  0xf6   : > { %v893_v55 = vmul.f32 %v1781_v50, %v2105_v14  ;;  %v920_v14 = vrot.slane %v919_v52, 2  ;;  %v938_v10 = vrot.slane %v937_v60, 2  ;;  %v915_v39 = vadd.f32 %v914_v21, %v913_v8 }
  0xf7   : > { %1782 = vrcp.f32 %v878_v49  ;;  %v869_v5 = vadd.f32 %v868_v57, %v867_v47  ;;  %1060 = vmatpush.msrb.mxu3 %v1003_v6  ;;  %v934_v40 = vrot.slane %v933_v24, 1  ;;  %v961_v47 = vrot.slane %v1998_v30, 1 }
  0xf8   : > { %v909_v0 = vmul.f32 %v901_v53, %v893_v55  ;;  %v921_v38 = vadd.f32 %v920_v14, %v919_v52  ;;  %v939_v63 = vadd.f32 %v938_v10, %v937_v60  ;;  %v929_v56 = vadd.f32 %v928_v26, %v927_v62 }
  0xf9   : > { %v870_v7 = vrot.slane %v869_v5, 1  ;;  %1061 = vmatpush.msrb.mxu3 %v1002_v1  ;;  %v903_v50 = vadd.f32 %v506_v43, %v2030_v23  ;;  %v916_v29 = vrot.slane %v915_v39, 1  ;;  %v935_v52 = vadd.f32 %v934_v40, %v933_v24  ;;  %v1751_v23 = vld [vmem:[%s2429_s7] ss:$0 sm:$0xff] }
  0xfa   : > { %v942_v61 = vrot.slane %v909_v0, 4  ;;  %v922_v35 = vrot.slane %v921_v38, 1  ;;  %v940_v45 = vrot.slane %v939_v63, 1  ;;  %v962_v55 = vrot.slane %v1998_v30, 2 }
  0xfb   : > { %v871_v20 = vadd.f32 %v870_v7, %v869_v5  ;;  %1062 = vmatpush.msrb.mxu3 %v1001_v12  ;;  %v963_v57 = vrot.slane %v1998_v30, 3  ;;  %v964_v6 = vrot.slane %v1998_v30, 4  ;;  %v965_v14 = vrot.slane %v1998_v30, 5 }
  0xfc   : > { %v943_v28 = vadd.f32 %v942_v61, %v909_v0  ;;  %v923_v18 = vadd.f32 %v922_v35, %v921_v38  ;;  %v941_v59 = vadd.f32 %v940_v45, %v939_v63  ;;  %v978_v5 = vadd.f32 %v962_v55, %v929_v56 }
  0xfd   : > { %v1783_v9 = vpop.eup %1782  ;;  %v879_v17 = vmax.f32 %v871_v20, 1e-20  ;;  %v979_v25 = vadd.f32 %v963_v57, %v935_v52  ;;  %v966_v7 = vrot.slane %v1998_v30, 6 }
  0xfe   : > { %v894_v15 = vmul.f32 %v1783_v9, %v2124_v51  ;;  %v944_v11 = vrot.slane %v943_v28, 2  ;;  %v977_v34 = vadd.f32 %v961_v47, %v923_v18  ;;  %v980_v1 = vadd.f32 %v964_v6, %v941_v59 }
  0xff   : > { %1784 = vrcp.f32 %v879_v17  ;;  %v988_v38 = vadd.f32 %v1751_v23, %v979_v25 }
 0x100   : > { %v910_v33 = vmul.f32 %v902_v2, %v894_v15  ;;  %v945_v42 = vadd.f32 %v944_v11, %v943_v28  ;;  %v986_v8 = vadd.f32 %v1751_v23, %v977_v34  ;;  %v987_v28 = vadd.f32 %v1751_v23, %v978_v5 }
 0x101   : > { %v989_v2 = vadd.f32 %v1751_v23, %v980_v1  ;;  %v996_v63 = vmax.f32 %v988_v38, 0.0 }
 0x102   : > { %v948_v37 = vrot.slane %v910_v33, 4  ;;  %v946_v46 = vrot.slane %v945_v42, 1  ;;  %v994_v11 = vmax.f32 %v986_v8, 0.0  ;;  %v995_v21 = vmax.f32 %v987_v28, 0.0 }
 0x103   : > { %v997_v35 = vmax.f32 %v989_v2, 0.0  ;;  %v1031_v18 = vrot.slane %v996_v63, 5  ;;  %v1752_v63 = vld [vmem:[%s2429_s7 + $0x1] ss:$0 sm:$0xff] }
 0x104   : > { %v949_v51 = vadd.f32 %v948_v37, %v910_v33  ;;  %v947_v60 = vadd.f32 %v946_v46, %v945_v42  ;;  %v967_v37 = vrot.slane %v1998_v30, 7  ;;  %v1028_v43 = vrot.slane %v995_v21, 6 }
 0x105   : > { %v1785_v49 = vpop.eup %1784  ;;  %v1034_v46 = vrot.slane %v997_v35, 4 }
 0x106   : > { %v950_v27 = vrot.slane %v949_v51, 2  ;;  %v895_v53 = vmul.f32 %v1785_v49, %v2158_v22  ;;  %v917_v22 = vadd.f32 %v916_v29, %v915_v39  ;;  %v981_v9 = vadd.f32 %v965_v14, %v947_v60 }
 0x107   : > { %v1025_v39 = vrot.slane %v994_v11, 7 }
 0x108   : > { %v951_v54 = vadd.f32 %v950_v27, %v949_v51  ;;  %v911_v16 = vmul.f32 %v903_v50, %v895_v53  ;;  %v976_v20 = vadd.f32 %v917_v22, %v1998_v30  ;;  %v990_v62 = vadd.f32 %v1751_v23, %v981_v9 }
 0x10a   : > { %v952_v0 = vrot.slane %v951_v54, 1  ;;  %v954_v61 = vrot.slane %v911_v16, 4  ;;  %v985_v24 = vadd.f32 %v1751_v23, %v976_v20  ;;  %v998_v26 = vmax.f32 %v990_v62, 0.0 }
 0x10c   : > { %v953_v32 = vadd.f32 %v952_v0, %v951_v54  ;;  %v955_v19 = vadd.f32 %v954_v61, %v911_v16  ;;  %v993_v45 = vmax.f32 %v985_v24, 0.0  ;;  %v1037_v47 = vrot.slane %v998_v26, 3 }
 0x10e   : > { %v982_v10 = vadd.f32 %v966_v7, %v953_v32  ;;  %v956_v12 = vrot.slane %v955_v19, 2  ;;  %v1027_v49 = vsel %vm1026_vm6, %v1025_v39, %v993_v45 }
 0x10f   : > { %v1030_v56 = vsel %vm1029_vm8, %v1028_v43, %v1027_v49 }
 0x110   : > { %v957_v15 = vadd.f32 %v956_v12, %v955_v19  ;;  %v991_v17 = vadd.f32 %v1751_v23, %v982_v10  ;;  %v1033_v29 = vsel %vm1032_vm10, %v1031_v18, %v1030_v56 }
 0x111   : > { %v1036_v52 = vsel %vm1035_vm12, %v1034_v46, %v1033_v29 }
 0x112   : > { %v958_v33 = vrot.slane %v957_v15, 1  ;;  %v999_v40 = vmax.f32 %v991_v17, 0.0  ;;  %v1039_v53 = vsel %vm1038_vm14, %v1037_v47, %v1036_v52 }
 0x114   : > { %v959_v42 = vadd.f32 %v958_v33, %v957_v15  ;;  %v1040_v30 = vrot.slane %v999_v40, 2 }
 0x116   : > { %v983_v51 = vadd.f32 %v967_v37, %v959_v42  ;;  %v1042_v55 = vsel %vm2434_vm2, %v1040_v30, %v1039_v53 }
 0x118   : > { %v992_v27 = vadd.f32 %v1751_v23, %v983_v51 }
 0x11a   : > { %v1000_v50 = vmax.f32 %v992_v27, 0.0 }
 0x11c   : > { %v1043_v54 = vrot.slane %v1000_v50, 1 }
 0x11e   : > { %v1045_v57 = vsel %vm2433_vm0, %v1043_v54, %v1042_v55  ;;  %vm1159_vm0 = vcmask 261248  }
 0x11f   : > { %1063 = vmatmul.f32.vlgmr.msrb.gmra.mxu3 %v1045_v57 }
 0x13d   : > { %v567_v59 = vpop.f32.mrf.mxu2 }
 0x145   : > { %v2215_v34 = vpop.f32.mrf.mxu2 }
 0x14d   : > { %v2217_v16 = vpop.f32.mrf.mxu2 }
 0x155   : > { %v2219_v60 = vpop.f32.mrf.mxu2 }
 0x15d   : > { %v2234_v61 = vpop.f32.mrf.mxu2 }
 0x165   : > { %v582_v12 = vpop.f32.mrf.mxu2 }
 0x16d   : > { %v2254_v62 = vpop.f32.mrf.mxu2 }
 0x175   : > { %v2263_v33 = vpop.f32.mrf.mxu2 }
 0x1a2   : > { %v2221_v0 = vpop.f32.mrf.mxu3 }
 0x1a3   : > { %1069 = vrot.lane.b32.xlu2 %v2221_v0, %s1833_s28  ;;  %v1081_v5 = vrot.slane %v2221_v0, 2  ;;  %v1080_v6 = vrot.slane %v2221_v0, 1  ;;  %v1087_v22 = vperm.slane %v2221_v0, 0  ;;  %v1083_v25 = vrot.slane %v2221_v0, 4 }
 0x1a4   : > { %v1082_v32 = vrot.slane %v2221_v0, 3  ;;  %v1084_v8 = vrot.slane %v2221_v0, 5  ;;  %v1086_v9 = vrot.slane %v2221_v0, 7  ;;  %v1085_v10 = vrot.slane %v2221_v0, 6 }
 0x1a5   : > { %v1089_v14 = vperm.slane %v1081_v5, 0  ;;  %v1088_v23 = vperm.slane %v1080_v6, 0  ;;  %v1091_v7 = vperm.slane %v1083_v25, 0  ;;  %v1329_v38 = vadd.f32 %v2221_v0, %v2215_v34 }
 0x1a6   : > { %v1090_v1 = vperm.slane %v1082_v32, 0  ;;  %v1092_v19 = vperm.slane %v1084_v8, 0  ;;  %v1094_v28 = vperm.slane %v1086_v9, 0  ;;  %v1093_v20 = vperm.slane %v1085_v10, 0 }
 0x1a7   : > { %1099 = vrot.lane.b32.xlu1 %v1089_v14, %s1834_s16  ;;  %1097 = vrot.lane.b32.xlu0 %v1088_v23, %s1834_s16  ;;  %v1328_v2 = vadd.f32 %v2221_v0, %v567_v59  ;;  %v1330_v15 = vadd.f32 %v2221_v0, %v2217_v16  ;;  %v1331_v11 = vadd.f32 %v2221_v0, %v2219_v60 }
 0x1a8   : > { %v1333_v17 = vadd.f32 %v2221_v0, %v582_v12  ;;  %v1332_v21 = vadd.f32 %v2221_v0, %v2234_v61  ;;  %v1334_v24 = vadd.f32 %v2221_v0, %v2254_v62  ;;  %v1335_v35 = vadd.f32 %v2221_v0, %v2263_v33 }
 0x1ab   : > { %1095 = vrot.lane.b32.xlu2 %v1087_v22, %s1834_s16 }
 0x1af   : > { %1103 = vrot.lane.b32.xlu1 %v1091_v7, %s1834_s16  ;;  %1101 = vrot.lane.b32.xlu0 %v1090_v1, %s1834_s16 }
 0x1b3   : > { %1105 = vrot.lane.b32.xlu2 %v1092_v19, %s1834_s16 }
 0x1b7   : > { %1109 = vrot.lane.b32.xlu1 %v1094_v28, %s1834_s16  ;;  %1107 = vrot.lane.b32.xlu0 %v1093_v20, %s1834_s16 }
 0x1bb   : > { %1346 = vrot.lane.b32.xlu2 %v1329_v38, %s1835_s17 }
 0x1bf   : > { %1344 = vrot.lane.b32.xlu1 %v1328_v2, %s1835_s17  ;;  %1348 = vrot.lane.b32.xlu0 %v1330_v15, %s1835_s17 }
 0x1c3   : > { %1350 = vrot.lane.b32.xlu2 %v1331_v11, %s1835_s17 }
 0x1c7   : > { %1354 = vrot.lane.b32.xlu1 %v1333_v17, %s1835_s17  ;;  %1352 = vrot.lane.b32.xlu0 %v1332_v21, %s1835_s17 }
 0x1cb   : > { %1356 = vrot.lane.b32.xlu2 %v1334_v24, %s1835_s17 }
 0x1cf   : > { %1358 = vrot.lane.b32.xlu0 %v1335_v35, %s1835_s17  ;;  %1450 = vrot.lane.b32.xlu1 %v1752_v63, %s1835_s17 }
 0x1fd   : > { %v2270_v42 = vpop.permute.xlu2 %1069 }
 0x1fe   : > { %v1072_v37 = vadd.f32 %v2270_v42, %v567_v59  ;;  %v1077_v18 = vadd.f32 %v2270_v42, %v582_v12  ;;  %v1074_v14 = vadd.f32 %v2270_v42, %v2217_v16  ;;  %v1073_v23 = vadd.f32 %v2270_v42, %v2215_v34 }
 0x205   : > { %v1096_v26 = vpop.permute.xlu2 %1095 }
 0x206   : > { %v1119_v39 = vadd.f32 %v1096_v26, %v1072_v37  ;;  %v1076_v37 = vadd.f32 %v2270_v42, %v2234_v61  ;;  %v1075_v26 = vadd.f32 %v2270_v42, %v2219_v60 }
 0x208   : > { %vm1127_vm1 = vcmp.ge.f32.partialorder %v1119_v39, 0.0  ;;  %v1135_v40 = vmul.f32 0.2, %v1119_v39 }
 0x20a   : > { %v1143_v43 = vsel %vm1127_vm1, %v1119_v39, %v1135_v40 }
 0x20b   : > { %v1151_v51 = vsel %vm712_vm3, %v1143_v43, -1e+30 }
 0x20c   : > { %v1160_v45 = vsel %vm1159_vm0, %v1151_v51, -inf }
 0x20d   : > { %v1161_v46 = vrot.slane %v1160_v45, 4  ;;  %v1106_v27 = vpop.permute.xlu2 %1105 }
 0x20e   : > { %v1124_v49 = vadd.f32 %v1106_v27, %v1077_v18 }
 0x20f   : > { %v1162_v47 = vmax.f32 %v1160_v45, %v1161_v46 }
 0x210   : > { %vm1132_vm2 = vcmp.ge.f32.partialorder %v1124_v49, 0.0  ;;  %v1140_v56 = vmul.f32 0.2, %v1124_v49 }
 0x211   : > { %v1163_v30 = vrot.slane %v1162_v47, 2 }
 0x212   : > { %v1148_v50 = vsel %vm1132_vm2, %v1124_v49, %v1140_v56 }
 0x213   : > { %v1164_v29 = vmax.f32 %v1162_v47, %v1163_v30  ;;  %v1156_v52 = vsel %vm717_vm13, %v1148_v50, -1e+30  ;;  %vm2436_vm13 = vcmask 1047559  }
 0x214   : > { %v1195_v53 = vsel %vm1159_vm0, %v1156_v52, -inf }
 0x215   : > { %v1165_v54 = vrot.slane %v1164_v29, 1  ;;  %v1196_v55 = vrot.slane %v1195_v53, 4 }
 0x217   : > { %v1166_v57 = vmax.f32 %v1164_v29, %v1165_v54  ;;  %v1197_v59 = vmax.f32 %v1195_v53, %v1196_v55  ;;  %v1079_v54 = vadd.f32 %v2270_v42, %v2263_v33 }
 0x219   : > { %v1216_v22 = vsub.f32 %v1151_v51, %v1166_v57  ;;  %v1198_v7 = vrot.slane %v1197_v59, 2  ;;  %v1100_v1 = vpop.permute.xlu1 %1099  ;;  %v1098_v19 = vpop.permute.xlu0 %1097 }
 0x21a   : > { %v1121_v28 = vadd.f32 %v1100_v1, %v1074_v14  ;;  %v1120_v20 = vadd.f32 %v1098_v19, %v1073_v23 }
 0x21b   : > { %v1224_v12 = vmul.f32 1.442695, %v1216_v22  ;;  %v1199_v38 = vmax.f32 %v1197_v59, %v1198_v7 }
 0x21c   : > { %vm1129_vm1 = vcmp.ge.f32.partialorder %v1121_v28, 0.0  ;;  %v1137_v2 = vmul.f32 0.2, %v1121_v28  ;;  %vm1128_vm3 = vcmp.ge.f32.partialorder %v1120_v20, 0.0  ;;  %v1136_v15 = vmul.f32 0.2, %v1120_v20 }
 0x21d   : > { %1786 = vpow2.f32 %v1224_v12  ;;  %v1200_v11 = vrot.slane %v1199_v38, 1 }
 0x21e   : > { %v1145_v17 = vsel %vm1129_vm1, %v1121_v28, %v1137_v2  ;;  %v1144_v21 = vsel %vm1128_vm3, %v1120_v20, %v1136_v15 }
 0x21f   : > { %v1201_v16 = vmax.f32 %v1199_v38, %v1200_v11  ;;  %v1153_v34 = vsel %vm714_vm7, %v1145_v17, -1e+30  ;;  %v1152_v24 = vsel %vm713_vm5, %v1144_v21, -1e+30 }
 0x220   : > { %v1174_v63 = vsel %vm1159_vm0, %v1153_v34, -inf  ;;  %v1167_v35 = vsel %vm1159_vm0, %v1152_v24, -inf }
 0x221   : > { %v1221_v39 = vsub.f32 %v1156_v52, %v1201_v16  ;;  %v1175_v40 = vrot.slane %v1174_v63, 4  ;;  %v1168_v43 = vrot.slane %v1167_v35, 4  ;;  %v1104_v51 = vpop.permute.xlu1 %1103  ;;  %v1102_v45 = vpop.permute.xlu0 %1101 }
 0x222   : > { %v1123_v18 = vadd.f32 %v1104_v51, %v1076_v37  ;;  %v1122_v46 = vadd.f32 %v1102_v45, %v1075_v26 }
 0x223   : > { %v1787_v27 = vpop.eup %1786  ;;  %v1234_v49 = vmul.f32 1.442695, %v1221_v39  ;;  %v1176_v47 = vmax.f32 %v1174_v63, %v1175_v40  ;;  %v1169_v56 = vmax.f32 %v1167_v35, %v1168_v43 }
 0x224   : > { %vm1131_vm5 = vcmp.ge.f32.partialorder %v1123_v18, 0.0  ;;  %v1139_v30 = vmul.f32 0.2, %v1123_v18  ;;  %vm1130_vm7 = vcmp.ge.f32.partialorder %v1122_v46, 0.0  ;;  %v1138_v50 = vmul.f32 0.2, %v1122_v46 }
 0x225   : > { %1788 = vpow2.f32 %v1234_v49  ;;  %v1177_v61 = vrot.slane %v1176_v47, 2  ;;  %v1170_v29 = vrot.slane %v1169_v56, 2  ;;  %v2295_v60 = vmul.f32 %v1787_v27, %v2006_v36 }
 0x226   : > { %v1147_v52 = vsel %vm1131_vm5, %v1123_v18, %v1139_v30  ;;  %v1146_v53 = vsel %vm1130_vm7, %v1122_v46, %v1138_v50  ;;  %v1078_v36 = vadd.f32 %v2270_v42, %v2254_v62 }
 0x227   : > { %v1178_v55 = vmax.f32 %v1176_v47, %v1177_v61  ;;  %v1171_v57 = vmax.f32 %v1169_v56, %v1170_v29  ;;  %v1155_v59 = vsel %vm716_vm11, %v1147_v52, -1e+30  ;;  %v1154_v14 = vsel %vm715_vm9, %v1146_v53, -1e+30 }
 0x228   : > { %v1188_v23 = vsel %vm1159_vm0, %v1155_v59, -inf  ;;  %v1181_v22 = vsel %vm1159_vm0, %v1154_v14, -inf  ;;  %v1248_v7 = vsel %vm1159_vm0, %v2295_v60, 0.0 }
 0x229   : > { %v1179_v1 = vrot.slane %v1178_v55, 1  ;;  %v1172_v33 = vrot.slane %v1171_v57, 1  ;;  %v1189_v19 = vrot.slane %v1188_v23, 4  ;;  %v1182_v28 = vrot.slane %v1181_v22, 4  ;;  %v1110_v20 = vpop.permute.xlu1 %1109  ;;  %v1108_v12 = vpop.permute.xlu0 %1107 }
 0x22a   : > { %v1126_v38 = vadd.f32 %v1110_v20, %v1079_v54  ;;  %v1125_v2 = vadd.f32 %v1108_v12, %v1078_v36  ;;  %v1249_v15 = vrot.slane %v1248_v7, 4 }
 0x22b   : > { %v1789_v11 = vpop.eup %1788  ;;  %v1180_v17 = vmax.f32 %v1178_v55, %v1179_v1  ;;  %v1173_v21 = vmax.f32 %v1171_v57, %v1172_v33  ;;  %v1190_v16 = vmax.f32 %v1188_v23, %v1189_v19  ;;  %v1183_v63 = vmax.f32 %v1181_v22, %v1182_v28 }
 0x22c   : > { %vm1134_vm9 = vcmp.ge.f32.partialorder %v1126_v38, 0.0  ;;  %v1142_v35 = vmul.f32 0.2, %v1126_v38  ;;  %vm1133_vm11 = vcmp.ge.f32.partialorder %v1125_v2, 0.0  ;;  %v1141_v62 = vmul.f32 0.2, %v1125_v2 }
 0x22d   : > { %v1218_v42 = vsub.f32 %v1153_v34, %v1180_v17  ;;  %v1217_v37 = vsub.f32 %v1152_v24, %v1173_v21  ;;  %v1191_v26 = vrot.slane %v1190_v16, 2  ;;  %v1184_v39 = vrot.slane %v1183_v63, 2 }
 0x22e   : > { %v1150_v40 = vsel %vm1134_vm9, %v1126_v38, %v1142_v35  ;;  %v1149_v43 = vsel %vm1133_vm11, %v1125_v2, %v1141_v62  ;;  %v1250_v51 = vadd.f32 %v1249_v15, %v1248_v7  ;;  %v2310_v45 = vmul.f32 %v1789_v11, %v2048_v4 }
 0x22f   : > { %v1228_v18 = vmul.f32 1.442695, %v1218_v42  ;;  %v1226_v46 = vmul.f32 1.442695, %v1217_v37  ;;  %v1192_v27 = vmax.f32 %v1190_v16, %v1191_v26  ;;  %v1185_v49 = vmax.f32 %v1183_v63, %v1184_v39 }
 0x230   : > { %v1158_v47 = vsel %vm719_vm4, %v1150_v40, -1e+30  ;;  %v1157_v56 = vsel %vm718_vm15, %v1149_v43, -1e+30  ;;  %v1251_v34 = vrot.slane %v1250_v51, 2  ;;  %v1283_v24 = vsel %vm1159_vm0, %v2310_v45, 0.0 }
 0x231   : > { %1790 = vpow2.f32 %v1228_v18  ;;  %v1193_v30 = vrot.slane %v1192_v27, 1  ;;  %v1186_v50 = vrot.slane %v1185_v49, 1  ;;  %v1209_v4 = vsel %vm1159_vm0, %v1158_v47, -inf }
 0x232   : > { %1792 = vpow2.f32 %v1226_v46  ;;  %v1210_v61 = vrot.slane %v1209_v4, 4  ;;  %v1202_v29 = vsel %vm1159_vm0, %v1157_v56, -inf  ;;  %v1252_v52 = vadd.f32 %v1251_v34, %v1250_v51 }
 0x233   : > { %v1194_v53 = vmax.f32 %v1192_v27, %v1193_v30  ;;  %v1187_v54 = vmax.f32 %v1185_v49, %v1186_v50  ;;  %v1203_v55 = vrot.slane %v1202_v29, 4  ;;  %v1284_v57 = vrot.slane %v1283_v24, 4 }
 0x234   : > { %v1211_v23 = vmax.f32 %v1209_v4, %v1210_v61  ;;  %v1253_v22 = vrot.slane %v1252_v52, 1  ;;  %vm2437_vm15 = vcmask 64512  }
 0x235   : > { %v1220_v36 = vsub.f32 %v1155_v59, %v1194_v53  ;;  %v1219_v7 = vsub.f32 %v1154_v14, %v1187_v54  ;;  %v1204_v1 = vmax.f32 %v1202_v29, %v1203_v55  ;;  %v1285_v33 = vadd.f32 %v1284_v57, %v1283_v24  ;;  %v1345_v57 = vpop.permute.xlu1 %1344  ;;  %vm2438_vm4 = vmmov %vm2437_vm15 }
 0x236   : > { %v1212_v19 = vrot.slane %v1211_v23, 2  ;;  %v1254_v28 = vadd.f32 %v1253_v22, %v1252_v52 }
 0x237   : > { %v1791_v20 = vpop.eup %1790  ;;  %v1232_v12 = vmul.f32 1.442695, %v1220_v36  ;;  %v1230_v38 = vmul.f32 1.442695, %v1219_v7  ;;  %v1205_v2 = vrot.slane %v1204_v1, 2  ;;  %v1286_v15 = vrot.slane %v1285_v33, 2 }
 0x238   : > { %v1793_v11 = vpop.eup %1792  ;;  %v1213_v17 = vmax.f32 %v1211_v23, %v1212_v19  ;;  %v1304_v21 = vmax.f32 %v1254_v28, 1e-20  ;;  %v2321_v16 = vmul.f32 %v1791_v20, %v2020_v58 }
 0x239   : > { %v2324_v63 = vmul.f32 %v1793_v11, %v2012_v44  ;;  %1794 = vpow2.f32 %v1232_v12  ;;  %v1206_v59 = vmax.f32 %v1204_v1, %v1205_v2  ;;  %v1287_v14 = vadd.f32 %v1286_v15, %v1285_v33 }
 0x23a   : > { %1796 = vpow2.f32 %v1230_v38  ;;  %v1214_v35 = vrot.slane %v1213_v17, 1  ;;  %v1262_v62 = vsel %vm1159_vm0, %v2321_v16, 0.0 }
 0x23b   : > { %v1255_v42 = vsel %vm1159_vm0, %v2324_v63, 0.0  ;;  %v1207_v37 = vrot.slane %v1206_v59, 1  ;;  %1798 = vrcp.f32 %v1304_v21  ;;  %v1263_v26 = vrot.slane %v1262_v62, 4 }
 0x23c   : > { %v1256_v39 = vrot.slane %v1255_v42, 4  ;;  %v1215_v58 = vmax.f32 %v1213_v17, %v1214_v35  ;;  %v1288_v40 = vrot.slane %v1287_v14, 1 }
 0x23d   : > { %v1208_v43 = vmax.f32 %v1206_v59, %v1207_v37  ;;  %v1264_v44 = vadd.f32 %v1263_v26, %v1262_v62 }
 0x23e   : > { %v1257_v51 = vadd.f32 %v1256_v39, %v1255_v42  ;;  %v1223_v18 = vsub.f32 %v1158_v47, %v1215_v58  ;;  %v1289_v46 = vadd.f32 %v1288_v40, %v1287_v14 }
 0x23f   : > { %v1795_v27 = vpop.eup %1794  ;;  %v1222_v49 = vsub.f32 %v1157_v56, %v1208_v43  ;;  %v1265_v34 = vrot.slane %v1264_v44, 2 }
 0x240   : > { %v1797_v24 = vpop.eup %1796  ;;  %v1258_v30 = vrot.slane %v1257_v51, 2  ;;  %v1238_v50 = vmul.f32 1.442695, %v1223_v18  ;;  %v1309_v4 = vmax.f32 %v1289_v46, 1e-20  ;;  %v2331_v61 = vmul.f32 %v1795_v27, %v2035_v41  ;;  %v1349_v18 = vpop.permute.xlu0 %1348 }
 0x241   : > { %v1799_v29 = vpop.eup %1798  ;;  %v2334_v52 = vmul.f32 %v1797_v24, %v2027_v13  ;;  %v1236_v53 = vmul.f32 1.442695, %v1222_v49  ;;  %v1266_v54 = vadd.f32 %v1265_v34, %v1264_v44  ;;  %v1347_v49 = vpop.permute.xlu2 %1346 }
 0x242   : > { %v1259_v55 = vadd.f32 %v1258_v30, %v1257_v51  ;;  %1800 = vpow2.f32 %v1238_v50  ;;  %v1320_v47 = vmul.f32 %v1799_v29, %v2295_v60  ;;  %v1276_v56 = vsel %vm1159_vm0, %v2331_v61, 0.0 }
 0x243   : > { %v1269_v23 = vsel %vm1159_vm0, %v2334_v52, 0.0  ;;  %1802 = vpow2.f32 %v1236_v53  ;;  %v1267_v41 = vrot.slane %v1266_v54, 1  ;;  %v1277_v22 = vrot.slane %v1276_v56, 4 }
 0x244   : > { %v1260_v36 = vrot.slane %v1259_v55, 1  ;;  %v1270_v7 = vrot.slane %v1269_v23, 4  ;;  %1804 = vrcp.f32 %v1309_v4  ;;  %v1368_v28 = vmul.f32 %v1345_v57, %v1320_v47 }
 0x245   : > { %v1268_v13 = vadd.f32 %v1267_v41, %v1266_v54  ;;  %v1278_v1 = vadd.f32 %v1277_v22, %v1276_v56 }
 0x246   : > { %v1261_v33 = vadd.f32 %v1260_v36, %v1259_v55  ;;  %v1271_v19 = vadd.f32 %v1270_v7, %v1269_v23  ;;  %v1376_v35 = vsel %vm1159_vm0, %v1368_v28, 0.0 }
 0x247   : > { %v1306_v20 = vmax.f32 %v1268_v13, 1e-20  ;;  %v1279_v60 = vrot.slane %v1278_v1, 2 }
 0x248   : > { %v1801_v12 = vpop.eup %1800  ;;  %v1305_v38 = vmax.f32 %v1261_v33, 1e-20  ;;  %v1272_v2 = vrot.slane %v1271_v19, 2 }
 0x249   : > { %v1803_v15 = vpop.eup %1802  ;;  %1806 = vrcp.f32 %v1306_v20  ;;  %v1280_v11 = vadd.f32 %v1279_v60, %v1278_v1  ;;  %v2342_v17 = vmul.f32 %v1801_v12, %v2090_v31  ;;  %v1355_v31 = vpop.permute.xlu1 %1354 }
 0x24a   : > { %v1805_v21 = vpop.eup %1804  ;;  %1808 = vrcp.f32 %v1305_v38  ;;  %v1273_v59 = vadd.f32 %v1272_v2, %v1271_v19  ;;  %v2345_v14 = vmul.f32 %v1803_v15, %v2072_v48  ;;  %v1377_v48 = vrot.slane %v1376_v35, 4  ;;  %v1353_v15 = vpop.permute.xlu0 %1352 }
 0x24b   : > { %v1325_v62 = vmul.f32 %v1805_v21, %v2310_v45  ;;  %v1281_v42 = vrot.slane %v1280_v11, 1  ;;  %v1297_v37 = vsel %vm1159_vm0, %v2342_v17, 0.0  ;;  %v1351_v21 = vpop.permute.xlu2 %1350 }
 0x24c   : > { %v1274_v26 = vrot.slane %v1273_v59, 1  ;;  %v1290_v39 = vsel %vm1159_vm0, %v2345_v14, 0.0  ;;  %v1298_v58 = vrot.slane %v1297_v37, 4  ;;  %v1378_v55 = vadd.f32 %v1377_v48, %v1376_v35 }
 0x24d   : > { %v1291_v40 = vrot.slane %v1290_v39, 4  ;;  %v1373_v43 = vmul.f32 %v1355_v31, %v1325_v62  ;;  %v1282_v44 = vadd.f32 %v1281_v42, %v1280_v11 }
 0x24e   : > { %v1275_v51 = vadd.f32 %v1274_v26, %v1273_v59  ;;  %v1299_v46 = vadd.f32 %v1298_v58, %v1297_v37 }
 0x24f   : > { %v1807_v27 = vpop.eup %1806  ;;  %v1292_v45 = vadd.f32 %v1291_v40, %v1290_v39  ;;  %v1308_v34 = vmax.f32 %v1282_v44, 1e-20  ;;  %v1411_v54 = vsel %vm1159_vm0, %v1373_v43, 0.0 }
 0x250   : > { %v1809_v24 = vpop.eup %1808  ;;  %v1307_v30 = vmax.f32 %v1275_v51, 1e-20  ;;  %v1322_v50 = vmul.f32 %v1807_v27, %v2321_v16  ;;  %v1300_v4 = vrot.slane %v1299_v46, 2  ;;  %v1412_v22 = vrot.slane %v1411_v54, 4 }
 0x251   : > { %v1321_v29 = vmul.f32 %v1809_v24, %v2324_v63  ;;  %v1293_v53 = vrot.slane %v1292_v45, 2  ;;  %1810 = vrcp.f32 %v1308_v34  ;;  %v1379_v63 = vrot.slane %v1378_v55, 2 }
 0x252   : > { %1812 = vrcp.f32 %v1307_v30  ;;  %v1370_v47 = vmul.f32 %v1349_v18, %v1322_v50  ;;  %v1301_v57 = vadd.f32 %v1300_v4, %v1299_v46  ;;  %v1413_v38 = vadd.f32 %v1412_v22, %v1411_v54  ;;  %v1451_v22 = vpop.permute.xlu1 %1450 }
 0x253   : > { %v1369_v56 = vmul.f32 %v1347_v49, %v1321_v29  ;;  %v1294_v23 = vadd.f32 %v1293_v53, %v1292_v45  ;;  %v1380_v37 = vadd.f32 %v1379_v63, %v1378_v55  ;;  %v1359_v55 = vpop.permute.xlu0 %1358 }
 0x254   : > { %v1390_v41 = vsel %vm1159_vm0, %v1370_v47, 0.0  ;;  %v1302_v36 = vrot.slane %v1301_v57, 1  ;;  %v1414_v40 = vrot.slane %v1413_v38, 2 }
 0x255   : > { %v1383_v7 = vsel %vm1159_vm0, %v1369_v56, 0.0  ;;  %v1295_v16 = vrot.slane %v1294_v23, 1  ;;  %v1391_v13 = vrot.slane %v1390_v41, 4  ;;  %v1381_v18 = vrot.slane %v1380_v37, 1 }
 0x256   : > { %v1384_v1 = vrot.slane %v1383_v7, 4  ;;  %v1303_v33 = vadd.f32 %v1302_v36, %v1301_v57  ;;  %v1415_v34 = vadd.f32 %v1414_v40, %v1413_v38  ;;  %v1357_v57 = vpop.permute.xlu2 %1356 }
 0x257   : > { %v1811_v19 = vpop.eup %1810  ;;  %v1296_v28 = vadd.f32 %v1295_v16, %v1294_v23  ;;  %v1392_v20 = vadd.f32 %v1391_v13, %v1390_v41  ;;  %v1382_v54 = vadd.f32 %v1381_v18, %v1380_v37 }
 0x258   : > { %v1813_v60 = vpop.eup %1812  ;;  %v1385_v12 = vadd.f32 %v1384_v1, %v1383_v7  ;;  %v1324_v2 = vmul.f32 %v1811_v19, %v2331_v61  ;;  %v1311_v11 = vmax.f32 %v1303_v33, 1e-20  ;;  %v1416_v7 = vrot.slane %v1415_v34, 1 }
 0x259   : > { %v1323_v59 = vmul.f32 %v1813_v60, %v2334_v52  ;;  %v1310_v35 = vmax.f32 %v1296_v28, 1e-20  ;;  %v1393_v62 = vrot.slane %v1392_v20, 2 }
 0x25a   : > { %v1386_v42 = vrot.slane %v1385_v12, 2  ;;  %v1372_v26 = vmul.f32 %v1353_v15, %v1324_v2  ;;  %1814 = vrcp.f32 %v1311_v11 }
 0x25b   : > { %v1371_v39 = vmul.f32 %v1351_v21, %v1323_v59  ;;  %1816 = vrcp.f32 %v1310_v35  ;;  %v1394_v31 = vadd.f32 %v1393_v62, %v1392_v20 }
 0x25c   : > { %v1387_v58 = vadd.f32 %v1386_v42, %v1385_v12  ;;  %v1404_v43 = vsel %vm1159_vm0, %v1372_v26, 0.0 }
 0x25d   : > { %v1397_v61 = vsel %vm1159_vm0, %v1371_v39, 0.0  ;;  %v1395_v44 = vrot.slane %v1394_v31, 1  ;;  %v1405_v51 = vrot.slane %v1404_v43, 4 }
 0x25e   : > { %v1398_v48 = vrot.slane %v1397_v61, 4  ;;  %v1388_v52 = vrot.slane %v1387_v58, 1 }
 0x25f   : > { %v1396_v46 = vadd.f32 %v1395_v44, %v1394_v31  ;;  %v1406_v27 = vadd.f32 %v1405_v51, %v1404_v43 }
 0x260   : > { %v1815_v49 = vpop.eup %1814  ;;  %v1399_v45 = vadd.f32 %v1398_v48, %v1397_v61  ;;  %v1389_v24 = vadd.f32 %v1388_v52, %v1387_v58 }
 0x261   : > { %v1817_v30 = vpop.eup %1816  ;;  %v1407_v50 = vrot.slane %v1406_v27, 2  ;;  %v1327_v4 = vmul.f32 %v1815_v49, %v2342_v17  ;;  %v1442_v56 = vadd.f32 %v1396_v46, %v1081_v5  ;;  %v1417_v5 = vadd.f32 %v1416_v7, %v1415_v34  ;;  %v1523_v7 = vld [vmem:[%s2428_s6] sm:$0xff] }
 0x262   : > { %v1400_v29 = vrot.slane %v1399_v45, 2  ;;  %v1326_v53 = vmul.f32 %v1817_v30, %v2345_v14  ;;  %v1441_v47 = vadd.f32 %v1389_v24, %v1080_v6  ;;  %v1440_v14 = vadd.f32 %v1382_v54, %v2221_v0 }
 0x263   : > { %v1408_v23 = vadd.f32 %v1407_v50, %v1406_v27  ;;  %v1375_v41 = vmul.f32 %v1359_v55, %v1327_v4  ;;  %v1455_v20 = vadd.f32 %v1451_v22, %v1442_v56  ;;  %v1445_v37 = vadd.f32 %v1417_v5, %v1084_v8 }
 0x264   : > { %v1374_v36 = vmul.f32 %v1357_v57, %v1326_v53  ;;  %v1454_v16 = vadd.f32 %v1451_v22, %v1441_v47  ;;  %v1401_v13 = vadd.f32 %v1400_v29, %v1399_v45  ;;  %v1453_v21 = vadd.f32 %v1451_v22, %v1440_v14  ;;  %v1824_v57 = vld [vmem:[%s1930_s14] sm:$0xff] }
 0x265   : > { %v1409_v17 = vrot.slane %v1408_v23, 1  ;;  %v1425_v1 = vsel %vm1159_vm0, %v1375_v41, 0.0  ;;  %v1463_v42 = vmax.f32 %v1455_v20, 0.0  ;;  %v1458_v18 = vadd.f32 %v1451_v22, %v1445_v37  ;;  %v1526_v41 = vld [vmem:[%s2428_s6 + $0x18] sm:$0xff] }
 0x266   : > { %v1426_v63 = vrot.slane %v1425_v1, 4  ;;  %v1402_v33 = vrot.slane %v1401_v13, 1  ;;  %v1418_v6 = vsel %vm1159_vm0, %v1374_v36, 0.0  ;;  %v1462_v38 = vmax.f32 %v1454_v16, 0.0  ;;  %v1525_v36 = vld [vmem:[%s2428_s6 + $0x10] sm:$0xff] }
 0x267   : > { %v1410_v19 = vadd.f32 %v1409_v17, %v1408_v23  ;;  %v1419_v28 = vrot.slane %v1418_v6, 4  ;;  %v1461_v43 = vmax.f32 %v1453_v21, 0.0  ;;  %v1482_v51 = vrot.slane %v1463_v42, 6 }
 0x268   : > { %v1427_v60 = vadd.f32 %v1426_v63, %v1425_v1  ;;  %v1403_v12 = vadd.f32 %v1402_v33, %v1401_v13  ;;  %v1480_v31 = vrot.slane %v1462_v38, 7  ;;  %v1466_v24 = vmax.f32 %v1458_v18, 0.0 }
 0x269   : > { %v1444_v2 = vadd.f32 %v1410_v19, %v1083_v25  ;;  %v1420_v15 = vadd.f32 %v1419_v28, %v1418_v6  ;;  %vm2435_vm0 = vcmask 1046534   ;;  %v1469_v56 = vsel %vm2437_vm15, %v1824_v57, 0.0  ;;  %v1753_v6 = vld [vmem:[%s2429_s7 + $0x2] ss:$0 sm:$0xff] }
 0x26a   : > { %v1428_v11 = vrot.slane %v1427_v60, 2  ;;  %v1443_v59 = vadd.f32 %v1403_v12, %v1082_v32  ;;  %v1481_v32 = vsel %vm1026_vm6, %v1480_v31, %v1461_v43  ;;  %v1488_v54 = vrot.slane %v1466_v24, 3  ;;  %1470 = vadd.xlane.f32.xlu0 %v1469_v56 }
 0x26b   : > { %v1421_v35 = vrot.slane %v1420_v15, 2  ;;  %v1457_v62 = vadd.f32 %v1451_v22, %v1444_v2  ;;  %v1483_v49 = vsel %vm1029_vm8, %v1482_v51, %v1481_v32  ;;  %vm2439_vm6 = vcmask 130048  }
 0x26c   : > { %v1429_v26 = vadd.f32 %v1428_v11, %v1427_v60  ;;  %v1456_v39 = vadd.f32 %v1451_v22, %v1443_v59  ;;  %vm2440_vm8 = vmmov %vm2439_vm6  ;;  %v1576_v33 = vand.u32 127, %v657_v3 }
 0x26d   : > { %v1422_v58 = vadd.f32 %v1421_v35, %v1420_v15  ;;  %v1465_v44 = vmax.f32 %v1457_v62, 0.0 }
 0x26e   : > { %v1430_v40 = vrot.slane %v1429_v26, 1  ;;  %v1464_v61 = vmax.f32 %v1456_v39, 0.0 }
 0x26f   : > { %v1423_v25 = vrot.slane %v1422_v58, 1  ;;  %v1486_v45 = vrot.slane %v1465_v44, 4 }
 0x270   : > { %v1431_v48 = vadd.f32 %v1430_v40, %v1429_v26  ;;  %v1484_v52 = vrot.slane %v1464_v61, 5 }
 0x271   : > { %v1424_v46 = vadd.f32 %v1423_v25, %v1422_v58 }
 0x272   : > { %v1447_v27 = vadd.f32 %v1431_v48, %v1086_v9  ;;  %v1485_v30 = vsel %vm1032_vm10, %v1484_v52, %v1483_v49  ;;  %vm1578_vm10 = vcmp.ge.s32.totalorder %v1576_v33, 2 }
 0x273   : > { %v1446_v8 = vadd.f32 %v1424_v46, %v1085_v10  ;;  %v1487_v53 = vsel %vm1035_vm12, %v1486_v45, %v1485_v30  ;;  %vm1579_vm12 = vcmp.lt.s32.totalorder %v1576_v33, 5 }
 0x274   : > { %v1460_v34 = vadd.f32 %v1451_v22, %v1447_v27  ;;  %v1489_v9 = vsel %vm1038_vm14, %v1488_v54, %v1487_v53  ;;  %vm1577_vm14 = vcmp.lt.s32.totalorder %v1576_v33, 2  ;;  %vm1580_vm2 = vmand %vm1578_vm10, %vm1579_vm12 }
 0x275   : > { %v1459_v50 = vadd.f32 %v1451_v22, %v1446_v8  ;;  %v1524_v22 = vld [vmem:[%s2428_s6 + $0x8] sm:$0xff]  ;;  %vm1587_vm1 = vmor %vm1577_vm14, %vm1580_vm2 }
 0x276   : > { %v1468_v4 = vmax.f32 %v1460_v34, 0.0 }
 0x277   : > { %v1467_v29 = vmax.f32 %v1459_v50, 0.0 }
 0x278   : > { %v1492_v55 = vrot.slane %v1468_v4, 1 }
 0x279   : > { %v1490_v47 = vrot.slane %v1467_v29, 2 }
 0x27b   : > { %v1491_v0 = vsel %vm2435_vm0, %v1490_v47, %v1489_v9 }
 0x27c   : > { %v1493_v10 = vsel %vm2436_vm13, %v1492_v55, %v1491_v0 }
 0x27d   : > { %1494 = vrot.lane.b32.xlu2 %v1493_v10, %s1833_s28 }
 0x2d7   : > { %v1495_v23 = vpop.permute.xlu2 %1494 }
 0x2d8   : > { %1515 = vmatpush.msra.mxu3 %v1495_v23 }
 0x2d9   : > { %1731 = vmatmul.msk.f32.vlgmr.msra.gmra.mxu3 %vm2438_vm4, %v1824_v57 }
 0x2da   : > { %1544 = vmatpush.msrb.mxu3 %v1526_v41 }
 0x2dc   : > { %1545 = vmatpush.msrb.mxu3 %v1524_v22 }
 0x2dd   : > { %v1471_v16 = vpop.xlane.xlu0 %1470 }
 0x2de   : > { %1566 = vmatpush.msra.mxu3 %v1525_v36  ;;  %v1520_v13 = vmax.f32 %v1471_v16, 1.0 }
 0x2e0   : > { %1567 = vmatpush.msra.mxu3 %v1523_v7  ;;  %1818 = vrcp.f32 %v1520_v13 }
 0x2e6   : > { %v1819_v17 = vpop.eup %1818 }
 0x35c   : > { %v1517_v1 = vpop.f32.mrf.mxu3 }
 0x35d   : > { %v1522_v14 = vmul.f32 %v1819_v17, %v1517_v1 }
 0x35f   : > { %1732 = vmatmul.msk.f32.vlgmr.msrb.gmra.mxu3 %vm2439_vm6, %v1522_v14 }
 0x367   : > { %1733 = vmatmul.msk.f32.vlgmr.msra.gmra.mxu3 %vm2440_vm8, %v1495_v23 }
 0x3e2   : > { %v1547_v63 = vpop.f32.mrf.mxu3 }
 0x3ea   : > { %v1569_v19 = vpop.f32.mrf.mxu3 }
 0x3eb   : > { %v1570_v28 = vadd.f32 %v1569_v19, %v1547_v63 }
 0x3ed   : > { %v1574_v20 = vadd.f32 %v1753_v6, %v1570_v28 }
 0x3ef   : > { %v1584_v5 = vsel %vm1580_vm2, %v1574_v20, -1e+30  ;;  %v1581_v60 = vsel %vm1577_vm14, %v1574_v20, -1e+30 }
 0x3f0   : > { %1585 = vmax.xlane.f32.xlu2 %v1584_v5  ;;  %1582 = vmax.xlane.f32.xlu1 %v1581_v60 }
 0x463   : > { %v1586_v12 = vpop.xlane.xlu2 %1585  ;;  %v1583_v38 = vpop.xlane.xlu1 %1582 }
 0x464   : > { %v1588_v3 = vsel %vm1577_vm14, %v1583_v38, %v1586_v12 }
 0x465   : > { %v1589_v2 = vsub.f32 %v1574_v20, %v1588_v3 }
 0x467   : > { %v1590_v15 = vsel %vm1587_vm1, %v1589_v2, -1e+30 }
 0x468   : > { %v1591_v11 = vmul.f32 1.442695, %v1590_v15 }
 0x46a   : > { %1820 = vpow2.f32 %v1591_v11 }
 0x470   : > { %v1821_v21 = vpop.eup %1820 }
 0x471   : > { %1596 = vadd.xlane.f32.xlu0 %v1821_v21  ;;  %v1593_v59 = vsel %vm1577_vm14, %v1821_v21, 0.0 }
 0x472   : > { %1594 = vadd.xlane.f32.xlu2 %v1593_v59 }
 0x4e4   : > { %v1597_v35 = vpop.xlane.xlu0 %1596 }
 0x4e5   : > { %v1595_v62 = vpop.xlane.xlu2 %1594 }
 0x4e6   : > { %v1598_v42 = vsub.f32 %v1597_v35, %v1595_v62 }
 0x4e8   : > { %v1599_v37 = vsel %vm1577_vm14, %v1595_v62, %v1598_v42 }
 0x4e9   : > { %1822 = vrcp.f32 %v1599_v37  ;;  %v1611_v58 = vand.u32 2147483648, %v1599_v37  ;;  %v1609_v43 = vand.u32 2147483647, %v1599_v37  ;;  %vm1605_vm5 = vweird.f32 %v1599_v37 }
 0x4eb   : > { %v1612_v25 = vor.u32 1.1754944e-38, %v1611_v58  ;;  %vm1610_vm9 = vcmp.eq.f32.partialorder %v1609_v43, 8.507059e+37 }
 0x4ef   : > { %v1823_v26 = vpop.eup %1822 }
 0x4f0   : > { %v1601_v39 = vmul.f32 %v1823_v26, %v1599_v37  ;;  %vm1606_vm3 = vweird.f32 %v1823_v26 }
 0x4f1   : > { %vm1607_vm7 = vmor %vm1605_vm5, %vm1606_vm3 }
 0x4f2   : > { %v1602_v31 = vsub.f32 1.0, %v1601_v39 }
 0x4f4   : > { %v1603_v40 = vmul.f32 %v1823_v26, %v1602_v31 }
 0x4f6   : > { %v1604_v61 = vadd.f32 %v1823_v26, %v1603_v40 }
 0x4f8   : > { %v1608_v44 = vsel %vm1607_vm7, %v1823_v26, %v1604_v61 }
 0x4f9   : > { %v1613_v51 = vsel %vm1610_vm9, %v1612_v25, %v1608_v44 }
 0x4fa   : > { %v1614_v48 = vmul.f32 %v1821_v21, %v1613_v51 }
 0x4fc   : > { %1615 = vst [vmem:[%s337_s12] sm:$0xff] %v1614_v48 }
 0x4fd PF: > { %s18_s27 = sadd.s32 1, %s1831_s27  }
 0x4fe   : > { %p15_p4 = scmp.ge.s32.totalorder %s18_s27, 6  }
 0x500   :  { %17 = sbr.rel (!%p15_p4) target bundleno = 1 (0x1), region = 88 }

</bundles_post_ra>
